<compile_context>
chip_gen: v7x
topology: tpu7x:2x2x1
jax: 0.10.0
libtpu: 0.0.40
codegen_flags: <defaults>
</compile_context>

<pallas_src>
import functools

import jax
import jax.numpy as jnp
from jax import lax
from jax.experimental import pallas as pl
from jax.experimental.pallas import tpu as pltpu

LN_EPS = 1e-5
NEG_INF = -1000000000.0  # matches torch masked_fill value


def _layernorm(x, w, b):
    # x: (S, D) f32, w/b: (1, D)
    mu = jnp.mean(x, axis=-1, keepdims=True)
    var = jnp.mean((x - mu) ** 2, axis=-1, keepdims=True)
    return (x - mu) * lax.rsqrt(var + LN_EPS) * w + b


# ---------------------------------------------------------------------------
# Fused kernel: all transformer blocks + final LN + logits.
# Grid: (B, L).  b is "parallel" (megacore), l is "arbitrary" (sequential carry).
# The (S, D) activation is carried across l in a VMEM scratch accumulator.
# ---------------------------------------------------------------------------
def fused_transformer_kernel(
    x_ref,
    wqkv_ref, bqkv_ref, wo_ref, bo_ref,
    w1_ref, b1_ref, w2_ref, b2_ref,
    ln1w_ref, ln1b_ref, ln2w_ref, ln2b_ref,
    lnfw_ref, lnfb_ref, wout_ref, bout_ref,
    attn_ref, logits_ref,
    x_scr,
    *, n_heads: int,
):
    l = pl.program_id(1)
    n_layers = pl.num_programs(1)

    # Load the embedding activation into the resident VMEM accumulator at layer 0.
    @pl.when(l == 0)
    def _():
        x_scr[...] = x_ref[0].astype(jnp.float32)

    x = x_scr[...]                                # (S, D) f32, carried across l
    S, D = x.shape
    hd = D // n_heads
    scale = 1.0 / (hd ** 0.5)

    # --- attention sub-layer (pre-norm) ---
    h = _layernorm(x, ln1w_ref[0], ln1b_ref[0])

    # Fused QKV projection: one (S, D) @ (D, 3D) matmul.
    qkv = jnp.dot(h, wqkv_ref[0], preferred_element_type=jnp.float32) + bqkv_ref[0]
    q = qkv[:, 0:D]
    k = qkv[:, D:2 * D]
    v = qkv[:, 2 * D:3 * D]

    # Head split via static lane slices (proven lowering path for small hd).
    def split_heads(t):
        return jnp.stack([t[:, i * hd:(i + 1) * hd] for i in range(n_heads)], axis=0)

    qh = split_heads(q)                           # (H, S, hd)
    kh = split_heads(k)
    vh = split_heads(v)

    # causal mask (tril): allowed where col <= row
    row = lax.broadcasted_iota(jnp.int32, (S, S), 0)
    col = lax.broadcasted_iota(jnp.int32, (S, S), 1)
    causal = (col <= row)[None, :, :]             # (1, S, S)

    sc = jnp.einsum('hqd,hkd->hqk', qh, kh,
                    preferred_element_type=jnp.float32) * scale       # (H, S, S)
    sc = jnp.where(causal, sc, NEG_INF)
    sc = sc - jnp.max(sc, axis=-1, keepdims=True)
    e = jnp.exp(sc)
    p = e / jnp.sum(e, axis=-1, keepdims=True)    # exact softmax (sums to 1)

    # single store of this layer's (H, S, S) attention tensor for this batch element
    attn_ref[0, 0] = p.astype(attn_ref.dtype)

    ctx = jnp.einsum('hqk,hkd->hqd', p, vh,
                     preferred_element_type=jnp.float32)               # (H, S, hd)

    # Head merge + output projection accumulated per head into a single (S, D)
    # accumulator: no (H, S, D) intermediate, no VPU reduction over heads.
    acc = jnp.dot(ctx[0], wo_ref[0, 0], preferred_element_type=jnp.float32)
    for i in range(1, n_heads):
        acc = acc + jnp.dot(ctx[i], wo_ref[0, i], preferred_element_type=jnp.float32)
    x = x + acc + bo_ref[0]                       # residual (dropout == identity)

    # --- feed-forward sub-layer (pre-norm) ---
    h2 = _layernorm(x, ln2w_ref[0], ln2b_ref[0])
    ff = jnp.maximum(
        jnp.dot(h2, w1_ref[0], preferred_element_type=jnp.float32) + b1_ref[0], 0.0)
    ff = jnp.dot(ff, w2_ref[0], preferred_element_type=jnp.float32) + b2_ref[0]
    x = x + ff

    x_scr[...] = x                                # carry to the next layer

    # --- final LayerNorm + vocab projection, fused into the last layer step ---
    @pl.when(l == n_layers - 1)
    def _():
        hf = _layernorm(x, lnfw_ref[...], lnfb_ref[...])
        logits_ref[0] = (jnp.dot(hf, wout_ref[...], preferred_element_type=jnp.float32)
                         + bout_ref[...]).astype(logits_ref.dtype)


# ---------------------------------------------------------------------------
# Wrapper
# ---------------------------------------------------------------------------
def _const_spec(shape):
    n = len(shape)
    return pl.BlockSpec(tuple(shape), lambda b, l, _n=n: (0,) * _n)


def _layer_spec(shape):
    # Stacked per-layer array (L, ...): one layer slab per grid step along l.
    n = len(shape)
    return pl.BlockSpec((1,) + tuple(shape[1:]),
                        lambda b, l, _n=n: (l,) + (0,) * (_n - 1))


def _vmem_limit_bytes(need_bytes):
    # Generation-aware cap: ~85% of physical VMEM, conservative fallback of 64 MiB.
    try:
        cap = int(pltpu.get_tpu_info().vmem_capacity_bytes)
    except Exception:
        cap = 64 << 20
    cap = int(cap * 0.85)
    return int(min(max(int(need_bytes), 32 << 20), cap))


def _estimate_need_bytes(S, D, d_ff, H, Vpad, layer_arrays, final_arrays):
    f32 = 4
    # One buffer of each I/O block (Pallas double-buffers -> x2 below).
    block = S * D * f32                                        # x block
    block += sum((int(a.size) // int(a.shape[0])) * f32 for a in layer_arrays)
    block += sum(int(a.size) * f32 for a in final_arrays)
    block += H * S * S * f32 + S * Vpad * f32                  # attn + logits blocks
    # In-kernel intermediates: qkv, q/k/v head stacks, scores+probs, ctx, ff, temps.
    interm = (S * 3 * D + 3 * S * D + 2 * H * S * S + S * D + S * d_ff + 6 * S * D) * f32
    scratch = S * D * f32
    return 2 * block + scratch + interm + (4 << 20)


def run_fused_transformer(x, params):
    B, S, D = x.shape
    L = params["n_layers"]
    H = params["n_heads"]
    blk = params["blocks"]
    fin = params["final"]                                      # (lnfw, lnfb, wout_pad, bout_pad)
    Vpad = fin[2].shape[1]
    d_ff = blk["w1"].shape[2]

    layer_names = ("wqkv", "bqkv", "wo", "bo", "w1", "b1", "w2", "b2",
                   "ln1w", "ln1b", "ln2w", "ln2b")
    layer_arrays = [blk[name] for name in layer_names]

    kernel = functools.partial(fused_transformer_kernel, n_heads=H)

    x_spec = pl.BlockSpec((1, S, D), lambda b, l: (b, 0, 0))
    in_specs = ([x_spec]
                + [_layer_spec(a.shape) for a in layer_arrays]
                + [_const_spec(a.shape) for a in fin])
    out_specs = [
        pl.BlockSpec((1, 1, H, S, S), lambda b, l: (b, l, 0, 0, 0)),
        pl.BlockSpec((1, S, Vpad), lambda b, l: (b, 0, 0)),
    ]
    out_shape = (
        jax.ShapeDtypeStruct((B, L, H, S, S), jnp.float32),
        jax.ShapeDtypeStruct((B, S, Vpad), jnp.float32),
    )

    need = _estimate_need_bytes(S, D, d_ff, H, Vpad, layer_arrays, fin)
    attn, logits_pad = pl.pallas_call(
        kernel,
        grid=(B, L),
        in_specs=in_specs,
        out_specs=out_specs,
        out_shape=out_shape,
        scratch_shapes=[pltpu.VMEM((S, D), jnp.float32)],
        compiler_params=pltpu.CompilerParams(
            dimension_semantics=("parallel", "arbitrary"),
            vmem_limit_bytes=_vmem_limit_bytes(need)),
    )(x, *layer_arrays, *fin)
    return attn, logits_pad


def quantum_transformer_forward(tokens, params):
    """tokens: (B, S) int32.  Returns (logits (B,S,V), [attn (B,H,S,S)] * n_layers)."""
    tok_emb = params["token_embedding"]           # (V, D)
    pos_emb = params["position_embedding"]        # (max_seq_len, D)
    B, S = tokens.shape
    # glue: embedding lookups in plain JAX (gather); positions broadcast over batch
    x = jnp.take(tok_emb, tokens, axis=0) + pos_emb[:S][None, :, :]
    x = x.astype(jnp.float32)

    attn, logits_pad = run_fused_transformer(x, params)
    logits = logits_pad[:, :, :params["vocab_size"]]
    attention_weights = [attn[:, li] for li in range(params["n_layers"])]
    return logits, attention_weights


# ---------------------------------------------------------------------------
# Deterministic parameter construction (PyTorch-default-style init shapes)
# ---------------------------------------------------------------------------
def _linear(key, in_f, out_f):
    k1, k2 = jax.random.split(key)
    bound = 1.0 / (in_f ** 0.5)
    w = jax.random.uniform(k1, (out_f, in_f), jnp.float32, -bound, bound)
    b = jax.random.uniform(k2, (out_f,), jnp.float32, -bound, bound)
    # pre-transpose W -> (in, out); bias -> (1, out) for 2D VMEM residency
    return w.T, b.reshape(1, out_f)


def build_params(key, vocab_size, d_model, n_heads, n_layers, d_ff, max_seq_len):
    head_dim = d_model // n_heads
    keys = jax.random.split(key, 3 + n_layers)
    params = {
        "vocab_size": vocab_size,
        "n_heads": n_heads,
        "n_layers": n_layers,
        "token_embedding": jax.random.normal(keys[0], (vocab_size, d_model), jnp.float32),
        "position_embedding": jax.random.normal(keys[1], (max_seq_len, d_model), jnp.float32),
    }

    per_layer = {name: [] for name in
                 ("wqkv", "bqkv", "wo", "bo", "w1", "b1", "w2", "b2",
                  "ln1w", "ln1b", "ln2w", "ln2b")}
    for li in range(n_layers):
        bkeys = jax.random.split(keys[2 + li], 6)
        wq, bq = _linear(bkeys[0], d_model, d_model)
        wk, bk = _linear(bkeys[1], d_model, d_model)
        wv, bv = _linear(bkeys[2], d_model, d_model)
        wo, bo = _linear(bkeys[3], d_model, d_model)
        w1, b1 = _linear(bkeys[4], d_model, d_ff)
        w2, b2 = _linear(bkeys[5], d_ff, d_model)
        # fused QKV weight/bias -> single (S,D)@(D,3D) matmul in-kernel
        per_layer["wqkv"].append(jnp.concatenate([wq, wk, wv], axis=1))    # (D, 3D)
        per_layer["bqkv"].append(jnp.concatenate([bq, bk, bv], axis=1))    # (1, 3D)
        # pre-split Wo per head: (in=D, out=D) -> (H, hd, D) for per-head accumulate
        per_layer["wo"].append(wo.reshape(n_heads, head_dim, d_model))     # (H, hd, D)
        per_layer["bo"].append(bo)                                         # (1, D)
        per_layer["w1"].append(w1)
        per_layer["b1"].append(b1)
        per_layer["w2"].append(w2)
        per_layer["b2"].append(b2)
        per_layer["ln1w"].append(jnp.ones((1, d_model), jnp.float32))
        per_layer["ln1b"].append(jnp.zeros((1, d_model), jnp.float32))
        per_layer["ln2w"].append(jnp.ones((1, d_model), jnp.float32))
        per_layer["ln2b"].append(jnp.zeros((1, d_model), jnp.float32))
    # stack each parameter over layers -> leading L axis for the fused kernel
    params["blocks"] = {name: jnp.stack(vals, axis=0) for name, vals in per_layer.items()}

    # final LN + output projection, vocab padded to a 128-lane multiple for a
    # lane-dense logits store (sliced back to vocab_size in the wrapper)
    wout, bout = _linear(keys[2 + n_layers], d_model, vocab_size)          # (D, V), (1, V)
    vpad = ((vocab_size + 127) // 128) * 128
    wout_pad = jnp.zeros((d_model, vpad), jnp.float32).at[:, :vocab_size].set(wout)
    bout_pad = jnp.zeros((1, vpad), jnp.float32).at[:, :vocab_size].set(bout)
    lnfw = jnp.ones((1, d_model), jnp.float32)
    lnfb = jnp.zeros((1, d_model), jnp.float32)
    params["final"] = (lnfw, lnfb, wout_pad, bout_pad)
    return params


if __name__ == "__main__":
    # small but shape-consistent config: vocab=2 (binary/quantum bits), d_model=32,
    # 4 heads, 2 layers, d_ff=64, seq=8, batch=2
    VOCAB, D_MODEL, N_HEADS, N_LAYERS, D_FF, MAX_SEQ = 2, 32, 4, 2, 64, 16
    B, S = 2, 8

    root = jax.random.PRNGKey(0)
    k_params, k_tokens = jax.random.split(root)
    params = build_params(k_params, VOCAB, D_MODEL, N_HEADS, N_LAYERS, D_FF, MAX_SEQ)
    tokens = jax.random.randint(k_tokens, (B, S), 0, VOCAB, dtype=jnp.int32)

    logits, attn_weights = quantum_transformer_forward(tokens, params)
    jax.block_until_ready(logits)
    jax.block_until_ready(attn_weights)

    assert logits.shape == (B, S, VOCAB)
    assert len(attn_weights) == N_LAYERS
    assert all(a.shape == (B, N_HEADS, S, S) for a in attn_weights)
    print("KERNEL_OK")
</pallas_src>

<mosaic_0001>
module attributes {stable_mosaic.version = 11 : i64} {
  func.func @fused_transformer_kernel(%arg0: i32, %arg1: i32, %arg2: memref<1x8x32xf32, #tpu.memory_space<vmem>>, %arg3: memref<1x32x96xf32, #tpu.memory_space<vmem>>, %arg4: memref<1x1x96xf32, #tpu.memory_space<vmem>>, %arg5: memref<1x4x8x32xf32, #tpu.memory_space<vmem>>, %arg6: memref<1x1x32xf32, #tpu.memory_space<vmem>>, %arg7: memref<1x32x64xf32, #tpu.memory_space<vmem>>, %arg8: memref<1x1x64xf32, #tpu.memory_space<vmem>>, %arg9: memref<1x64x32xf32, #tpu.memory_space<vmem>>, %arg10: memref<1x1x32xf32, #tpu.memory_space<vmem>>, %arg11: memref<1x1x32xf32, #tpu.memory_space<vmem>>, %arg12: memref<1x1x32xf32, #tpu.memory_space<vmem>>, %arg13: memref<1x1x32xf32, #tpu.memory_space<vmem>>, %arg14: memref<1x1x32xf32, #tpu.memory_space<vmem>>, %arg15: memref<1x32xf32, #tpu.memory_space<vmem>>, %arg16: memref<1x32xf32, #tpu.memory_space<vmem>>, %arg17: memref<32x128xf32, #tpu.memory_space<vmem>>, %arg18: memref<1x128xf32, #tpu.memory_space<vmem>>, %arg19: memref<1x1x4x8x8xf32, #tpu.memory_space<vmem>>, %arg20: memref<1x8x128xf32, #tpu.memory_space<vmem>>, %arg21: memref<8x32xf32, #tpu.memory_space<vmem>>) attributes {dimension_semantics = [#tpu.dimension_semantics<parallel>, #tpu.dimension_semantics<arbitrary>], iteration_bounds = array<i64: 2, 2>, scalar_prefetch = 0 : i64, scratch_operands = 1 : i64, tpu.core_type = #tpu.core_type<tc>, window_params = [{transform_indices = @transform_0, window_bounds = array<i64: 1, 8, 32>}, {transform_indices = @transform_1, window_bounds = array<i64: 1, 32, 96>}, {transform_indices = @transform_2, window_bounds = array<i64: 1, 1, 96>}, {transform_indices = @transform_3, window_bounds = array<i64: 1, 4, 8, 32>}, {transform_indices = @transform_4, window_bounds = array<i64: 1, 1, 32>}, {transform_indices = @transform_5, window_bounds = array<i64: 1, 32, 64>}, {transform_indices = @transform_6, window_bounds = array<i64: 1, 1, 64>}, {transform_indices = @transform_7, window_bounds = array<i64: 1, 64, 32>}, {transform_indices = @transform_8, window_bounds = array<i64: 1, 1, 32>}, {transform_indices = @transform_9, window_bounds = array<i64: 1, 1, 32>}, {transform_indices = @transform_10, window_bounds = array<i64: 1, 1, 32>}, {transform_indices = @transform_11, window_bounds = array<i64: 1, 1, 32>}, {transform_indices = @transform_12, window_bounds = array<i64: 1, 1, 32>}, {pipeline_mode = #tpu.pipeline_mode<synchronous>, transform_indices = @transform_13, window_bounds = array<i64: 1, 32>}, {pipeline_mode = #tpu.pipeline_mode<synchronous>, transform_indices = @transform_14, window_bounds = array<i64: 1, 32>}, {pipeline_mode = #tpu.pipeline_mode<synchronous>, transform_indices = @transform_15, window_bounds = array<i64: 32, 128>}, {pipeline_mode = #tpu.pipeline_mode<synchronous>, transform_indices = @transform_16, window_bounds = array<i64: 1, 128>}, {transform_indices = @transform_17, window_bounds = array<i64: 1, 1, 4, 8, 8>}, {transform_indices = @transform_18, window_bounds = array<i64: 1, 8, 128>}]} {
    %c0_i32 = arith.constant 0 : i32
    %0 = arith.cmpi eq, %arg1, %c0_i32 : i32
    %1 = arith.extui %0 : i1 to i32
    %c0_i32_0 = arith.constant 0 : i32
    %2 = arith.cmpi ne, %1, %c0_i32_0 : i32
    scf.if %2 {
      %c0_79 = arith.constant 0 : index
      %c0_80 = arith.constant 0 : index
      %c0_81 = arith.constant 0 : index
      %166 = vector.load %arg2[%c0_79, %c0_80, %c0_81] : memref<1x8x32xf32, #tpu.memory_space<vmem>>, vector<1x8x32xf32>
      %167 = vector.shape_cast %166 : vector<1x8x32xf32> to vector<8x32xf32>
      %c0_82 = arith.constant 0 : index
      %c0_83 = arith.constant 0 : index
      %168 = vector.load %arg21[%c0_82, %c0_83] : memref<8x32xf32, #tpu.memory_space<vmem>>, vector<8x32xf32>
      tpu.vector_store %arg21[%c0_82, %c0_83], %167 {strides = array<i32>} : memref<8x32xf32, #tpu.memory_space<vmem>>, vector<8x32xf32>,
    } else {
    }
    %c0 = arith.constant 0 : index
    %c0_1 = arith.constant 0 : index
    %3 = vector.load %arg21[%c0, %c0_1] : memref<8x32xf32, #tpu.memory_space<vmem>>, vector<8x32xf32>
    %c0_2 = arith.constant 0 : index
    %c0_3 = arith.constant 0 : index
    %c0_4 = arith.constant 0 : index
    %4 = vector.load %arg11[%c0_2, %c0_3, %c0_4] : memref<1x1x32xf32, #tpu.memory_space<vmem>>, vector<1x1x32xf32>
    %5 = vector.shape_cast %4 : vector<1x1x32xf32> to vector<1x32xf32>
    %c0_5 = arith.constant 0 : index
    %c0_6 = arith.constant 0 : index
    %c0_7 = arith.constant 0 : index
    %6 = vector.load %arg12[%c0_5, %c0_6, %c0_7] : memref<1x1x32xf32, #tpu.memory_space<vmem>>, vector<1x1x32xf32>
    %7 = vector.shape_cast %6 : vector<1x1x32xf32> to vector<1x32xf32>
    %cst = arith.constant dense<0.000000e+00> : vector<8xf32>
    %8 = vector.multi_reduction <add>, %3, %cst [1] : vector<8x32xf32> to vector<8xf32>
    %9 = vector.shape_cast %8 : vector<8xf32> to vector<8x1xf32>
    %cst_8 = arith.constant 3.200000e+01 : f32
    %10 = vector.broadcast %cst_8 : f32 to vector<8x1xf32>
    %11 = arith.divf %9, %10 : vector<8x1xf32>
    %12 = vector.broadcast %11 : vector<8x1xf32> to vector<8x32xf32>
    %13 = arith.subf %3, %12 : vector<8x32xf32>
    %14 = arith.mulf %13, %13 : vector<8x32xf32>
    %cst_9 = arith.constant dense<0.000000e+00> : vector<8xf32>
    %15 = vector.multi_reduction <add>, %14, %cst_9 [1] : vector<8x32xf32> to vector<8xf32>
    %16 = vector.shape_cast %15 : vector<8xf32> to vector<8x1xf32>
    %cst_10 = arith.constant 3.200000e+01 : f32
    %17 = vector.broadcast %cst_10 : f32 to vector<8x1xf32>
    %18 = arith.divf %16, %17 : vector<8x1xf32>
    %19 = vector.broadcast %11 : vector<8x1xf32> to vector<8x32xf32>
    %20 = arith.subf %3, %19 : vector<8x32xf32>
    %cst_11 = arith.constant 9.99999974E-6 : f32
    %21 = vector.broadcast %cst_11 : f32 to vector<8x1xf32>
    %22 = arith.addf %18, %21 : vector<8x1xf32>
    %23 = math.rsqrt %22 : vector<8x1xf32>
    %24 = vector.broadcast %23 : vector<8x1xf32> to vector<8x32xf32>
    %25 = arith.mulf %20, %24 : vector<8x32xf32>
    %26 = vector.broadcast %5 : vector<1x32xf32> to vector<8x32xf32>
    %27 = arith.mulf %25, %26 : vector<8x32xf32>
    %28 = vector.broadcast %7 : vector<1x32xf32> to vector<8x32xf32>
    %29 = arith.addf %27, %28 : vector<8x32xf32>
    %c0_12 = arith.constant 0 : index
    %c0_13 = arith.constant 0 : index
    %c0_14 = arith.constant 0 : index
    %30 = vector.load %arg3[%c0_12, %c0_13, %c0_14] : memref<1x32x96xf32, #tpu.memory_space<vmem>>, vector<1x32x96xf32>
    %31 = vector.shape_cast %30 : vector<1x32x96xf32> to vector<32x96xf32>
    %cst_15 = arith.constant dense<0.000000e+00> : vector<8x96xf32>
    %32 = tpu.matmul %29, %31, %cst_15 {dimension_numbers = #tpu.dot_dimension_numbers<[1], [0], [0], [1], [0, 0, 1, 1], [], []>} : vector<8x32xf32>, vector<32x96xf32>, vector<8x96xf32> -> vector<8x96xf32>
    %c0_16 = arith.constant 0 : index
    %c0_17 = arith.constant 0 : index
    %c0_18 = arith.constant 0 : index
    %33 = vector.load %arg4[%c0_16, %c0_17, %c0_18] : memref<1x1x96xf32, #tpu.memory_space<vmem>>, vector<1x1x96xf32>
    %34 = vector.shape_cast %33 : vector<1x1x96xf32> to vector<1x96xf32>
    %35 = vector.broadcast %34 : vector<1x96xf32> to vector<8x96xf32>
    %36 = arith.addf %32, %35 : vector<8x96xf32>
    %37 = vector.extract_strided_slice %36 {offsets = [0, 0], sizes = [8, 32], strides = [1, 1]} : vector<8x96xf32> to vector<8x32xf32>
    %38 = vector.extract_strided_slice %36 {offsets = [0, 32], sizes = [8, 32], strides = [1, 1]} : vector<8x96xf32> to vector<8x32xf32>
    %39 = vector.extract_strided_slice %36 {offsets = [0, 64], sizes = [8, 32], strides = [1, 1]} : vector<8x96xf32> to vector<8x32xf32>
    %40 = vector.extract_strided_slice %37 {offsets = [0, 0], sizes = [8, 8], strides = [1, 1]} : vector<8x32xf32> to vector<8x8xf32>
    %41 = vector.extract_strided_slice %37 {offsets = [0, 8], sizes = [8, 8], strides = [1, 1]} : vector<8x32xf32> to vector<8x8xf32>
    %42 = vector.extract_strided_slice %37 {offsets = [0, 16], sizes = [8, 8], strides = [1, 1]} : vector<8x32xf32> to vector<8x8xf32>
    %43 = vector.extract_strided_slice %37 {offsets = [0, 24], sizes = [8, 8], strides = [1, 1]} : vector<8x32xf32> to vector<8x8xf32>
    %44 = vector.shape_cast %40 : vector<8x8xf32> to vector<1x8x8xf32>
    %45 = vector.shape_cast %41 : vector<8x8xf32> to vector<1x8x8xf32>
    %46 = vector.shape_cast %42 : vector<8x8xf32> to vector<1x8x8xf32>
    %47 = vector.shape_cast %43 : vector<8x8xf32> to vector<1x8x8xf32>
    %48 = tpu.concatenate %44, %45, %46, %47 in 0 : vector<1x8x8xf32>, vector<1x8x8xf32>, vector<1x8x8xf32>, vector<1x8x8xf32> -> vector<4x8x8xf32>
    %49 = vector.extract_strided_slice %38 {offsets = [0, 0], sizes = [8, 8], strides = [1, 1]} : vector<8x32xf32> to vector<8x8xf32>
    %50 = vector.extract_strided_slice %38 {offsets = [0, 8], sizes = [8, 8], strides = [1, 1]} : vector<8x32xf32> to vector<8x8xf32>
    %51 = vector.extract_strided_slice %38 {offsets = [0, 16], sizes = [8, 8], strides = [1, 1]} : vector<8x32xf32> to vector<8x8xf32>
    %52 = vector.extract_strided_slice %38 {offsets = [0, 24], sizes = [8, 8], strides = [1, 1]} : vector<8x32xf32> to vector<8x8xf32>
    %53 = vector.shape_cast %49 : vector<8x8xf32> to vector<1x8x8xf32>
    %54 = vector.shape_cast %50 : vector<8x8xf32> to vector<1x8x8xf32>
    %55 = vector.shape_cast %51 : vector<8x8xf32> to vector<1x8x8xf32>
    %56 = vector.shape_cast %52 : vector<8x8xf32> to vector<1x8x8xf32>
    %57 = tpu.concatenate %53, %54, %55, %56 in 0 : vector<1x8x8xf32>, vector<1x8x8xf32>, vector<1x8x8xf32>, vector<1x8x8xf32> -> vector<4x8x8xf32>
    %58 = vector.extract_strided_slice %39 {offsets = [0, 0], sizes = [8, 8], strides = [1, 1]} : vector<8x32xf32> to vector<8x8xf32>
    %59 = vector.extract_strided_slice %39 {offsets = [0, 8], sizes = [8, 8], strides = [1, 1]} : vector<8x32xf32> to vector<8x8xf32>
    %60 = vector.extract_strided_slice %39 {offsets = [0, 16], sizes = [8, 8], strides = [1, 1]} : vector<8x32xf32> to vector<8x8xf32>
    %61 = vector.extract_strided_slice %39 {offsets = [0, 24], sizes = [8, 8], strides = [1, 1]} : vector<8x32xf32> to vector<8x8xf32>
    %62 = vector.shape_cast %58 : vector<8x8xf32> to vector<1x8x8xf32>
    %63 = vector.shape_cast %59 : vector<8x8xf32> to vector<1x8x8xf32>
    %64 = vector.shape_cast %60 : vector<8x8xf32> to vector<1x8x8xf32>
    %65 = vector.shape_cast %61 : vector<8x8xf32> to vector<1x8x8xf32>
    %66 = tpu.concatenate %62, %63, %64, %65 in 0 : vector<1x8x8xf32>, vector<1x8x8xf32>, vector<1x8x8xf32>, vector<1x8x8xf32> -> vector<4x8x8xf32>
    %67 = tpu.iota {dimensions = array<i32: 0>} : vector<8x8xi32>
    %68 = tpu.iota {dimensions = array<i32: 1>} : vector<8x8xi32>
    %69 = arith.cmpi sle, %68, %67 : vector<8x8xi32>
    %70 = vector.shape_cast %69 : vector<8x8xi1> to vector<1x8x8xi1>
    "tpu.trace_start"() <{level = 10 : i32, message = "hqd,hkd->hqk"}> : () -> ()
    %cst_19 = arith.constant dense<0.000000e+00> : vector<4x8x8xf32>
    %71 = tpu.matmul %48, %57, %cst_19 {dimension_numbers = #tpu.dot_dimension_numbers<[2], [2], [1], [1], [0, 0, 0, 1, 1, 1], [0], [0]>} : vector<4x8x8xf32>, vector<4x8x8xf32>, vector<4x8x8xf32> -> vector<4x8x8xf32>
    "tpu.trace_stop"() : () -> ()
    %cst_20 = arith.constant 0.353553385 : f32
    %72 = vector.broadcast %cst_20 : f32 to vector<4x8x8xf32>
    %73 = arith.mulf %71, %72 : vector<4x8x8xf32>
    %cst_21 = arith.constant -1.000000e+09 : f32
    %74 = vector.shape_cast %70 : vector<1x8x8xi1> to vector<1x8x8xi1>
    %75 = vector.broadcast %74 : vector<1x8x8xi1> to vector<4x8x8xi1>
    %76 = vector.broadcast %cst_21 : f32 to vector<4x8x8xf32>
    %77 = arith.select %75, %73, %76 : vector<4x8x8xi1>, vector<4x8x8xf32>
    %cst_22 = arith.constant dense<0xFF800000> : vector<4x8xf32>
    %78 = vector.multi_reduction <maximumf>, %77, %cst_22 [2] : vector<4x8x8xf32> to vector<4x8xf32>
    %79 = vector.shape_cast %78 : vector<4x8xf32> to vector<4x8x1xf32>
    %80 = vector.broadcast %79 : vector<4x8x1xf32> to vector<4x8x8xf32>
    %81 = arith.subf %77, %80 : vector<4x8x8xf32>
    %82 = math.exp %81 : vector<4x8x8xf32>
    %cst_23 = arith.constant dense<0.000000e+00> : vector<4x8xf32>
    %83 = vector.multi_reduction <add>, %82, %cst_23 [2] : vector<4x8x8xf32> to vector<4x8xf32>
    %84 = vector.shape_cast %83 : vector<4x8xf32> to vector<4x8x1xf32>
    %85 = vector.broadcast %84 : vector<4x8x1xf32> to vector<4x8x8xf32>
    %86 = arith.divf %82, %85 : vector<4x8x8xf32>
    %c0_24 = arith.constant 0 : index
    %c0_25 = arith.constant 0 : index
    %c0_26 = arith.constant 0 : index
    %c0_27 = arith.constant 0 : index
    %c0_28 = arith.constant 0 : index
    %87 = vector.load %arg19[%c0_24, %c0_25, %c0_26, %c0_27, %c0_28] : memref<1x1x4x8x8xf32, #tpu.memory_space<vmem>>, vector<1x1x4x8x8xf32>
    %88 = vector.shape_cast %87 : vector<1x1x4x8x8xf32> to vector<4x8x8xf32>
    %89 = vector.shape_cast %86 : vector<4x8x8xf32> to vector<1x1x4x8x8xf32>
    tpu.vector_store %arg19[%c0_24, %c0_25, %c0_26, %c0_27, %c0_28], %89 {strides = array<i32>} : memref<1x1x4x8x8xf32, #tpu.memory_space<vmem>>, vector<1x1x4x8x8xf32>,
    "tpu.trace_start"() <{level = 10 : i32, message = "hqk,hkd->hqd"}> : () -> ()
    %cst_29 = arith.constant dense<0.000000e+00> : vector<4x8x8xf32>
    %90 = tpu.matmul %86, %66, %cst_29 {dimension_numbers = #tpu.dot_dimension_numbers<[2], [1], [1], [2], [0, 0, 0, 1, 1, 2], [0], [0]>} : vector<4x8x8xf32>, vector<4x8x8xf32>, vector<4x8x8xf32> -> vector<4x8x8xf32>
    "tpu.trace_stop"() : () -> ()
    %91 = vector.extract_strided_slice %90 {offsets = [0, 0, 0], sizes = [1, 8, 8], strides = [1, 1, 1]} : vector<4x8x8xf32> to vector<1x8x8xf32>
    %92 = vector.shape_cast %91 : vector<1x8x8xf32> to vector<8x8xf32>
    %c0_30 = arith.constant 0 : index
    %c0_31 = arith.constant 0 : index
    %c0_32 = arith.constant 0 : index
    %c0_33 = arith.constant 0 : index
    %93 = vector.load %arg5[%c0_30, %c0_31, %c0_32, %c0_33] : memref<1x4x8x32xf32, #tpu.memory_space<vmem>>, vector<1x1x8x32xf32>
    %94 = vector.shape_cast %93 : vector<1x1x8x32xf32> to vector<8x32xf32>
    %cst_34 = arith.constant dense<0.000000e+00> : vector<8x32xf32>
    %95 = tpu.matmul %92, %94, %cst_34 {dimension_numbers = #tpu.dot_dimension_numbers<[1], [0], [0], [1], [0, 0, 1, 1], [], []>} : vector<8x8xf32>, vector<8x32xf32>, vector<8x32xf32> -> vector<8x32xf32>
    %96 = vector.extract_strided_slice %90 {offsets = [1, 0, 0], sizes = [1, 8, 8], strides = [1, 1, 1]} : vector<4x8x8xf32> to vector<1x8x8xf32>
    %97 = vector.shape_cast %96 : vector<1x8x8xf32> to vector<8x8xf32>
    %c0_35 = arith.constant 0 : index
    %c1 = arith.constant 1 : index
    %c0_36 = arith.constant 0 : index
    %c0_37 = arith.constant 0 : index
    %98 = vector.load %arg5[%c0_35, %c1, %c0_36, %c0_37] : memref<1x4x8x32xf32, #tpu.memory_space<vmem>>, vector<1x1x8x32xf32>
    %99 = vector.shape_cast %98 : vector<1x1x8x32xf32> to vector<8x32xf32>
    %cst_38 = arith.constant dense<0.000000e+00> : vector<8x32xf32>
    %100 = tpu.matmul %97, %99, %cst_38 {dimension_numbers = #tpu.dot_dimension_numbers<[1], [0], [0], [1], [0, 0, 1, 1], [], []>} : vector<8x8xf32>, vector<8x32xf32>, vector<8x32xf32> -> vector<8x32xf32>
    %101 = arith.addf %95, %100 : vector<8x32xf32>
    %102 = vector.extract_strided_slice %90 {offsets = [2, 0, 0], sizes = [1, 8, 8], strides = [1, 1, 1]} : vector<4x8x8xf32> to vector<1x8x8xf32>
    %103 = vector.shape_cast %102 : vector<1x8x8xf32> to vector<8x8xf32>
    %c0_39 = arith.constant 0 : index
    %c2 = arith.constant 2 : index
    %c0_40 = arith.constant 0 : index
    %c0_41 = arith.constant 0 : index
    %104 = vector.load %arg5[%c0_39, %c2, %c0_40, %c0_41] : memref<1x4x8x32xf32, #tpu.memory_space<vmem>>, vector<1x1x8x32xf32>
    %105 = vector.shape_cast %104 : vector<1x1x8x32xf32> to vector<8x32xf32>
    %cst_42 = arith.constant dense<0.000000e+00> : vector<8x32xf32>
    %106 = tpu.matmul %103, %105, %cst_42 {dimension_numbers = #tpu.dot_dimension_numbers<[1], [0], [0], [1], [0, 0, 1, 1], [], []>} : vector<8x8xf32>, vector<8x32xf32>, vector<8x32xf32> -> vector<8x32xf32>
    %107 = arith.addf %101, %106 : vector<8x32xf32>
    %108 = vector.extract_strided_slice %90 {offsets = [3, 0, 0], sizes = [1, 8, 8], strides = [1, 1, 1]} : vector<4x8x8xf32> to vector<1x8x8xf32>
    %109 = vector.shape_cast %108 : vector<1x8x8xf32> to vector<8x8xf32>
    %c0_43 = arith.constant 0 : index
    %c3 = arith.constant 3 : index
    %c0_44 = arith.constant 0 : index
    %c0_45 = arith.constant 0 : index
    %110 = vector.load %arg5[%c0_43, %c3, %c0_44, %c0_45] : memref<1x4x8x32xf32, #tpu.memory_space<vmem>>, vector<1x1x8x32xf32>
    %111 = vector.shape_cast %110 : vector<1x1x8x32xf32> to vector<8x32xf32>
    %cst_46 = arith.constant dense<0.000000e+00> : vector<8x32xf32>
    %112 = tpu.matmul %109, %111, %cst_46 {dimension_numbers = #tpu.dot_dimension_numbers<[1], [0], [0], [1], [0, 0, 1, 1], [], []>} : vector<8x8xf32>, vector<8x32xf32>, vector<8x32xf32> -> vector<8x32xf32>
    %113 = arith.addf %107, %112 : vector<8x32xf32>
    %114 = arith.addf %3, %113 : vector<8x32xf32>
    %c0_47 = arith.constant 0 : index
    %c0_48 = arith.constant 0 : index
    %c0_49 = arith.constant 0 : index
    %115 = vector.load %arg6[%c0_47, %c0_48, %c0_49] : memref<1x1x32xf32, #tpu.memory_space<vmem>>, vector<1x1x32xf32>
    %116 = vector.shape_cast %115 : vector<1x1x32xf32> to vector<1x32xf32>
    %117 = vector.broadcast %116 : vector<1x32xf32> to vector<8x32xf32>
    %118 = arith.addf %114, %117 : vector<8x32xf32>
    %c0_50 = arith.constant 0 : index
    %c0_51 = arith.constant 0 : index
    %c0_52 = arith.constant 0 : index
    %119 = vector.load %arg13[%c0_50, %c0_51, %c0_52] : memref<1x1x32xf32, #tpu.memory_space<vmem>>, vector<1x1x32xf32>
    %120 = vector.shape_cast %119 : vector<1x1x32xf32> to vector<1x32xf32>
    %c0_53 = arith.constant 0 : index
    %c0_54 = arith.constant 0 : index
    %c0_55 = arith.constant 0 : index
    %121 = vector.load %arg14[%c0_53, %c0_54, %c0_55] : memref<1x1x32xf32, #tpu.memory_space<vmem>>, vector<1x1x32xf32>
    %122 = vector.shape_cast %121 : vector<1x1x32xf32> to vector<1x32xf32>
    %cst_56 = arith.constant dense<0.000000e+00> : vector<8xf32>
    %123 = vector.multi_reduction <add>, %118, %cst_56 [1] : vector<8x32xf32> to vector<8xf32>
    %124 = vector.shape_cast %123 : vector<8xf32> to vector<8x1xf32>
    %cst_57 = arith.constant 3.200000e+01 : f32
    %125 = vector.broadcast %cst_57 : f32 to vector<8x1xf32>
    %126 = arith.divf %124, %125 : vector<8x1xf32>
    %127 = vector.broadcast %126 : vector<8x1xf32> to vector<8x32xf32>
    %128 = arith.subf %118, %127 : vector<8x32xf32>
    %129 = arith.mulf %128, %128 : vector<8x32xf32>
    %cst_58 = arith.constant dense<0.000000e+00> : vector<8xf32>
    %130 = vector.multi_reduction <add>, %129, %cst_58 [1] : vector<8x32xf32> to vector<8xf32>
    %131 = vector.shape_cast %130 : vector<8xf32> to vector<8x1xf32>
    %cst_59 = arith.constant 3.200000e+01 : f32
    %132 = vector.broadcast %cst_59 : f32 to vector<8x1xf32>
    %133 = arith.divf %131, %132 : vector<8x1xf32>
    %134 = vector.broadcast %126 : vector<8x1xf32> to vector<8x32xf32>
    %135 = arith.subf %118, %134 : vector<8x32xf32>
    %cst_60 = arith.constant 9.99999974E-6 : f32
    %136 = vector.broadcast %cst_60 : f32 to vector<8x1xf32>
    %137 = arith.addf %133, %136 : vector<8x1xf32>
    %138 = math.rsqrt %137 : vector<8x1xf32>
    %139 = vector.broadcast %138 : vector<8x1xf32> to vector<8x32xf32>
    %140 = arith.mulf %135, %139 : vector<8x32xf32>
    %141 = vector.broadcast %120 : vector<1x32xf32> to vector<8x32xf32>
    %142 = arith.mulf %140, %141 : vector<8x32xf32>
    %143 = vector.broadcast %122 : vector<1x32xf32> to vector<8x32xf32>
    %144 = arith.addf %142, %143 : vector<8x32xf32>
    %c0_61 = arith.constant 0 : index
    %c0_62 = arith.constant 0 : index
    %c0_63 = arith.constant 0 : index
    %145 = vector.load %arg7[%c0_61, %c0_62, %c0_63] : memref<1x32x64xf32, #tpu.memory_space<vmem>>, vector<1x32x64xf32>
    %146 = vector.shape_cast %145 : vector<1x32x64xf32> to vector<32x64xf32>
    %cst_64 = arith.constant dense<0.000000e+00> : vector<8x64xf32>
    %147 = tpu.matmul %144, %146, %cst_64 {dimension_numbers = #tpu.dot_dimension_numbers<[1], [0], [0], [1], [0, 0, 1, 1], [], []>} : vector<8x32xf32>, vector<32x64xf32>, vector<8x64xf32> -> vector<8x64xf32>
    %c0_65 = arith.constant 0 : index
    %c0_66 = arith.constant 0 : index
    %c0_67 = arith.constant 0 : index
    %148 = vector.load %arg8[%c0_65, %c0_66, %c0_67] : memref<1x1x64xf32, #tpu.memory_space<vmem>>, vector<1x1x64xf32>
    %149 = vector.shape_cast %148 : vector<1x1x64xf32> to vector<1x64xf32>
    %150 = vector.broadcast %149 : vector<1x64xf32> to vector<8x64xf32>
    %151 = arith.addf %147, %150 : vector<8x64xf32>
    %cst_68 = arith.constant 0.000000e+00 : f32
    %152 = vector.broadcast %cst_68 : f32 to vector<8x64xf32>
    %153 = arith.maximumf %151, %152 : vector<8x64xf32>
    %c0_69 = arith.constant 0 : index
    %c0_70 = arith.constant 0 : index
    %c0_71 = arith.constant 0 : index
    %154 = vector.load %arg9[%c0_69, %c0_70, %c0_71] : memref<1x64x32xf32, #tpu.memory_space<vmem>>, vector<1x64x32xf32>
    %155 = vector.shape_cast %154 : vector<1x64x32xf32> to vector<64x32xf32>
    %cst_72 = arith.constant dense<0.000000e+00> : vector<8x32xf32>
    %156 = tpu.matmul %153, %155, %cst_72 {dimension_numbers = #tpu.dot_dimension_numbers<[1], [0], [0], [1], [0, 0, 1, 1], [], []>} : vector<8x64xf32>, vector<64x32xf32>, vector<8x32xf32> -> vector<8x32xf32>
    %c0_73 = arith.constant 0 : index
    %c0_74 = arith.constant 0 : index
    %c0_75 = arith.constant 0 : index
    %157 = vector.load %arg10[%c0_73, %c0_74, %c0_75] : memref<1x1x32xf32, #tpu.memory_space<vmem>>, vector<1x1x32xf32>
    %158 = vector.shape_cast %157 : vector<1x1x32xf32> to vector<1x32xf32>
    %159 = vector.broadcast %158 : vector<1x32xf32> to vector<8x32xf32>
    %160 = arith.addf %156, %159 : vector<8x32xf32>
    %161 = arith.addf %118, %160 : vector<8x32xf32>
    %c0_76 = arith.constant 0 : index
    %c0_77 = arith.constant 0 : index
    %162 = vector.load %arg21[%c0_76, %c0_77] : memref<8x32xf32, #tpu.memory_space<vmem>>, vector<8x32xf32>
    tpu.vector_store %arg21[%c0_76, %c0_77], %161 {strides = array<i32>} : memref<8x32xf32, #tpu.memory_space<vmem>>, vector<8x32xf32>,
    %c1_i32 = arith.constant 1 : i32
    %163 = arith.cmpi eq, %arg1, %c1_i32 : i32
    %164 = arith.extui %163 : i1 to i32
    %c0_i32_78 = arith.constant 0 : i32
    %165 = arith.cmpi ne, %164, %c0_i32_78 : i32
    scf.if %165 {
      %c0_79 = arith.constant 0 : index
      %c0_80 = arith.constant 0 : index
      %166 = vector.load %arg15[%c0_79, %c0_80] : memref<1x32xf32, #tpu.memory_space<vmem>>, vector<1x32xf32>
      %c0_81 = arith.constant 0 : index
      %c0_82 = arith.constant 0 : index
      %167 = vector.load %arg16[%c0_81, %c0_82] : memref<1x32xf32, #tpu.memory_space<vmem>>, vector<1x32xf32>
      %cst_83 = arith.constant dense<0.000000e+00> : vector<8xf32>
      %168 = vector.multi_reduction <add>, %161, %cst_83 [1] : vector<8x32xf32> to vector<8xf32>
      %169 = vector.shape_cast %168 : vector<8xf32> to vector<8x1xf32>
      %cst_84 = arith.constant 3.200000e+01 : f32
      %170 = vector.broadcast %cst_84 : f32 to vector<8x1xf32>
      %171 = arith.divf %169, %170 : vector<8x1xf32>
      %172 = vector.broadcast %171 : vector<8x1xf32> to vector<8x32xf32>
      %173 = arith.subf %161, %172 : vector<8x32xf32>
      %174 = arith.mulf %173, %173 : vector<8x32xf32>
      %cst_85 = arith.constant dense<0.000000e+00> : vector<8xf32>
      %175 = vector.multi_reduction <add>, %174, %cst_85 [1] : vector<8x32xf32> to vector<8xf32>
      %176 = vector.shape_cast %175 : vector<8xf32> to vector<8x1xf32>
      %cst_86 = arith.constant 3.200000e+01 : f32
      %177 = vector.broadcast %cst_86 : f32 to vector<8x1xf32>
      %178 = arith.divf %176, %177 : vector<8x1xf32>
      %179 = vector.broadcast %171 : vector<8x1xf32> to vector<8x32xf32>
      %180 = arith.subf %161, %179 : vector<8x32xf32>
      %cst_87 = arith.constant 9.99999974E-6 : f32
      %181 = vector.broadcast %cst_87 : f32 to vector<8x1xf32>
      %182 = arith.addf %178, %181 : vector<8x1xf32>
      %183 = math.rsqrt %182 : vector<8x1xf32>
      %184 = vector.broadcast %183 : vector<8x1xf32> to vector<8x32xf32>
      %185 = arith.mulf %180, %184 : vector<8x32xf32>
      %186 = vector.broadcast %166 : vector<1x32xf32> to vector<8x32xf32>
      %187 = arith.mulf %185, %186 : vector<8x32xf32>
      %188 = vector.broadcast %167 : vector<1x32xf32> to vector<8x32xf32>
      %189 = arith.addf %187, %188 : vector<8x32xf32>
      %c0_88 = arith.constant 0 : index
      %c0_89 = arith.constant 0 : index
      %190 = vector.load %arg17[%c0_88, %c0_89] : memref<32x128xf32, #tpu.memory_space<vmem>>, vector<32x128xf32>
      %cst_90 = arith.constant dense<0.000000e+00> : vector<8x128xf32>
      %191 = tpu.matmul %189, %190, %cst_90 {dimension_numbers = #tpu.dot_dimension_numbers<[1], [0], [0], [1], [0, 0, 1, 1], [], []>} : vector<8x32xf32>, vector<32x128xf32>, vector<8x128xf32> -> vector<8x128xf32>
      %c0_91 = arith.constant 0 : index
      %c0_92 = arith.constant 0 : index
      %192 = vector.load %arg18[%c0_91, %c0_92] : memref<1x128xf32, #tpu.memory_space<vmem>>, vector<1x128xf32>
      %193 = vector.broadcast %192 : vector<1x128xf32> to vector<8x128xf32>
      %194 = arith.addf %191, %193 : vector<8x128xf32>
      %c0_93 = arith.constant 0 : index
      %c0_94 = arith.constant 0 : index
      %c0_95 = arith.constant 0 : index
      %195 = vector.load %arg20[%c0_93, %c0_94, %c0_95] : memref<1x8x128xf32, #tpu.memory_space<vmem>>, vector<1x8x128xf32>
      %196 = vector.shape_cast %195 : vector<1x8x128xf32> to vector<8x128xf32>
      %197 = vector.shape_cast %194 : vector<8x128xf32> to vector<1x8x128xf32>
      tpu.vector_store %arg20[%c0_93, %c0_94, %c0_95], %197 {strides = array<i32>} : memref<1x8x128xf32, #tpu.memory_space<vmem>>, vector<1x8x128xf32>,
    } else {
    }
    return
  }
  func.func @transform_0(%arg0: i32, %arg1: i32) -> (i32, i32, i32) {
    %c0_i32 = arith.constant 0 : i32
    %c0_i32_0 = arith.constant 0 : i32
    %c0_i32_1 = arith.constant 0 : i32
    return %arg0, %c0_i32, %c0_i32_0 : i32, i32, i32
  }
  func.func @transform_1(%arg0: i32, %arg1: i32) -> (i32, i32, i32) {
    %c0_i32 = arith.constant 0 : i32
    %c0_i32_0 = arith.constant 0 : i32
    %c0_i32_1 = arith.constant 0 : i32
    return %arg1, %c0_i32, %c0_i32_0 : i32, i32, i32
  }
  func.func @transform_2(%arg0: i32, %arg1: i32) -> (i32, i32, i32) {
    %c0_i32 = arith.constant 0 : i32
    %c0_i32_0 = arith.constant 0 : i32
    %c0_i32_1 = arith.constant 0 : i32
    return %arg1, %c0_i32, %c0_i32_0 : i32, i32, i32
  }
  func.func @transform_3(%arg0: i32, %arg1: i32) -> (i32, i32, i32, i32) {
    %c0_i32 = arith.constant 0 : i32
    %c0_i32_0 = arith.constant 0 : i32
    %c0_i32_1 = arith.constant 0 : i32
    %c0_i32_2 = arith.constant 0 : i32
    return %arg1, %c0_i32, %c0_i32_0, %c0_i32_1 : i32, i32, i32, i32
  }
  func.func @transform_4(%arg0: i32, %arg1: i32) -> (i32, i32, i32) {
    %c0_i32 = arith.constant 0 : i32
    %c0_i32_0 = arith.constant 0 : i32
    %c0_i32_1 = arith.constant 0 : i32
    return %arg1, %c0_i32, %c0_i32_0 : i32, i32, i32
  }
  func.func @transform_5(%arg0: i32, %arg1: i32) -> (i32, i32, i32) {
    %c0_i32 = arith.constant 0 : i32
    %c0_i32_0 = arith.constant 0 : i32
    %c0_i32_1 = arith.constant 0 : i32
    return %arg1, %c0_i32, %c0_i32_0 : i32, i32, i32
  }
  func.func @transform_6(%arg0: i32, %arg1: i32) -> (i32, i32, i32) {
    %c0_i32 = arith.constant 0 : i32
    %c0_i32_0 = arith.constant 0 : i32
    %c0_i32_1 = arith.constant 0 : i32
    return %arg1, %c0_i32, %c0_i32_0 : i32, i32, i32
  }
  func.func @transform_7(%arg0: i32, %arg1: i32) -> (i32, i32, i32) {
    %c0_i32 = arith.constant 0 : i32
    %c0_i32_0 = arith.constant 0 : i32
    %c0_i32_1 = arith.constant 0 : i32
    return %arg1, %c0_i32, %c0_i32_0 : i32, i32, i32
  }
  func.func @transform_8(%arg0: i32, %arg1: i32) -> (i32, i32, i32) {
    %c0_i32 = arith.constant 0 : i32
    %c0_i32_0 = arith.constant 0 : i32
    %c0_i32_1 = arith.constant 0 : i32
    return %arg1, %c0_i32, %c0_i32_0 : i32, i32, i32
  }
  func.func @transform_9(%arg0: i32, %arg1: i32) -> (i32, i32, i32) {
    %c0_i32 = arith.constant 0 : i32
    %c0_i32_0 = arith.constant 0 : i32
    %c0_i32_1 = arith.constant 0 : i32
    return %arg1, %c0_i32, %c0_i32_0 : i32, i32, i32
  }
  func.func @transform_10(%arg0: i32, %arg1: i32) -> (i32, i32, i32) {
    %c0_i32 = arith.constant 0 : i32
    %c0_i32_0 = arith.constant 0 : i32
    %c0_i32_1 = arith.constant 0 : i32
    return %arg1, %c0_i32, %c0_i32_0 : i32, i32, i32
  }
  func.func @transform_11(%arg0: i32, %arg1: i32) -> (i32, i32, i32) {
    %c0_i32 = arith.constant 0 : i32
    %c0_i32_0 = arith.constant 0 : i32
    %c0_i32_1 = arith.constant 0 : i32
    return %arg1, %c0_i32, %c0_i32_0 : i32, i32, i32
  }
  func.func @transform_12(%arg0: i32, %arg1: i32) -> (i32, i32, i32) {
    %c0_i32 = arith.constant 0 : i32
    %c0_i32_0 = arith.constant 0 : i32
    %c0_i32_1 = arith.constant 0 : i32
    return %arg1, %c0_i32, %c0_i32_0 : i32, i32, i32
  }
  func.func @transform_13(%arg0: i32, %arg1: i32) -> (i32, i32) {
    %c0_i32 = arith.constant 0 : i32
    %c0_i32_0 = arith.constant 0 : i32
    %c0_i32_1 = arith.constant 0 : i32
    return %c0_i32, %c0_i32_0 : i32, i32
  }
  func.func @transform_14(%arg0: i32, %arg1: i32) -> (i32, i32) {
    %c0_i32 = arith.constant 0 : i32
    %c0_i32_0 = arith.constant 0 : i32
    %c0_i32_1 = arith.constant 0 : i32
    return %c0_i32, %c0_i32_0 : i32, i32
  }
  func.func @transform_15(%arg0: i32, %arg1: i32) -> (i32, i32) {
    %c0_i32 = arith.constant 0 : i32
    %c0_i32_0 = arith.constant 0 : i32
    %c0_i32_1 = arith.constant 0 : i32
    return %c0_i32, %c0_i32_0 : i32, i32
  }
  func.func @transform_16(%arg0: i32, %arg1: i32) -> (i32, i32) {
    %c0_i32 = arith.constant 0 : i32
    %c0_i32_0 = arith.constant 0 : i32
    %c0_i32_1 = arith.constant 0 : i32
    return %c0_i32, %c0_i32_0 : i32, i32
  }
  func.func @transform_17(%arg0: i32, %arg1: i32) -> (i32, i32, i32, i32, i32) {
    %c0_i32 = arith.constant 0 : i32
    %c0_i32_0 = arith.constant 0 : i32
    %c0_i32_1 = arith.constant 0 : i32
    %c0_i32_2 = arith.constant 0 : i32
    return %arg0, %arg1, %c0_i32, %c0_i32_0, %c0_i32_1 : i32, i32, i32, i32, i32
  }
  func.func @transform_18(%arg0: i32, %arg1: i32) -> (i32, i32, i32) {
    %c0_i32 = arith.constant 0 : i32
    %c0_i32_0 = arith.constant 0 : i32
    %c0_i32_1 = arith.constant 0 : i32
    return %arg0, %c0_i32, %c0_i32_0 : i32, i32, i32
  }
}

</mosaic_0001>

<bundles_post_ra>
// kernel: tpu_custom_call.1
= control target key start
LH: loop header
LB: loop body
LE: loop exit
PB: predicated region body
PF: predicated region fallthrough
CT: control target
= control target key end

     0   :  { %s4286_s0 = inlined_call_operand.hbm [shape: f32[2,8,32], index: 0, kind: input, shape index: {}]   ;;  %s4287_s1 = inlined_call_operand.vmem [shape: f32[2,32,96], index: 1, kind: input, shape index: {}]   ;;  %s4288_s2 = inlined_call_operand.vmem [shape: f32[2,1,96], index: 2, kind: input, shape index: {}]   ;;  %s4289_s3 = inlined_call_operand.vmem [shape: f32[2,4,8,32], index: 3, kind: input, shape index: {}]   ;;  %s4290_s4 = inlined_call_operand.hbm [shape: f32[2,1,32], index: 4, kind: input, shape index: {}]   ;;  %s4291_s5 = inlined_call_operand.vmem [shape: f32[2,32,64], index: 5, kind: input, shape index: {}]   ;;  %s4292_s6 = inlined_call_operand.hbm [shape: f32[2,1,64], index: 6, kind: input, shape index: {}]   ;;  %s4293_s7 = inlined_call_operand.vmem [shape: f32[2,64,32], index: 7, kind: input, shape index: {}]   ;;  %s4294_s8 = inlined_call_operand.hbm [shape: f32[2,1,32], index: 8, kind: input, shape index: {}]   ;;  %s4295_s9 = inlined_call_operand.hbm [shape: f32[2,1,32], index: 9, kind: input, shape index: {}]   ;;  %s4296_s10 = inlined_call_operand.vmem [shape: f32[2,1,32], index: 10, kind: input, shape index: {}]   ;;  %s4297_s11 = inlined_call_operand.vmem [shape: f32[2,1,32], index: 11, kind: input, shape index: {}]   ;;  %s4298_s12 = inlined_call_operand.vmem [shape: f32[2,1,32], index: 12, kind: input, shape index: {}]   ;;  %s4299_s13 = inlined_call_operand.vmem [shape: f32[1,32], index: 13, kind: input, shape index: {}]   ;;  %s4300_s14 = inlined_call_operand.vmem [shape: f32[1,32], index: 14, kind: input, shape index: {}]   ;;  %s4301_s15 = inlined_call_operand.vmem [shape: f32[32,128], index: 15, kind: input, shape index: {}]   ;;  %s4302_s16 = inlined_call_operand.vmem [shape: f32[1,128], index: 16, kind: input, shape index: {}]   ;;  %s4303_s17 = inlined_call_operand.hbm [shape: f32[2,2,4,8,8], index: 17, kind: output, shape index: {0}]   ;;  %s4304_s18 = inlined_call_operand.hbm [shape: f32[2,8,128], index: 18, kind: output, shape index: {1}]  }
   0x1   :  { %4347 = sst [smem:[#allocation42_spill]] %s4286_s0 }
   0x2   :  { %4348 = sst [smem:[#allocation43_spill]] %s4287_s1 }
   0x3   :  { %4349 = sst [smem:[#allocation44_spill]] %s4288_s2 }
   0x4   :  { %4350 = sst [smem:[#allocation45_spill]] %s4289_s3 }
   0x5   :  { %4351 = sst [smem:[#allocation46_spill]] %s4290_s4 }
   0x6   :  { %4352 = sst [smem:[#allocation47_spill]] %s4291_s5 }
   0x7   :  { %4353 = sst [smem:[#allocation48_spill]] %s4292_s6 }
   0x8   :  { %4354 = sst [smem:[#allocation49_spill]] %s4293_s7 }
   0x9   :  { %4355 = sst [smem:[#allocation50_spill]] %s4294_s8 }
   0xa   :  { %4356 = sst [smem:[#allocation51_spill]] %s4295_s9 }
   0xb   :  { %4357 = sst [smem:[#allocation52_spill]] %s4296_s10 }
   0xc   :  { %4358 = sst [smem:[#allocation53_spill]] %s4297_s11 }
   0xd   :  { %4359 = sst [smem:[#allocation54_spill]] %s4298_s12 }
   0xe   :  { %4360 = sst [smem:[#allocation55_spill]] %s4299_s13 }
   0xf   :  { %4361 = sst [smem:[#allocation56_spill]] %s4300_s14 }
  0x10   :  { %4362 = sst [smem:[#allocation57_spill]] %s4301_s15 }
  0x11   :  { %4363 = sst [smem:[#allocation58_spill]] %s4302_s16 }
  0x12   :  { %4364 = sst [smem:[#allocation59_spill]] %s4303_s17 }
  0x13   :  { %4365 = sst [smem:[#allocation60_spill]] %s4304_s18 }
  0x14   :  { %24 = vsyncpa [#allocation4], 0 }
  0x15   :  { %26 = vsyncpa [#allocation4 + $0x1], 0 }
  0x16   :  { %27 = vsyncpa [#allocation7], 0 }
  0x17   :  { %29 = vsyncpa [#allocation7 + $0x1], 0 }
  0x18   :  { %30 = vsyncpa [#allocation10], 0 }
  0x19   :  { %32 = vsyncpa [#allocation10 + $0x1], 0 }
  0x1a   :  { %33 = vsyncpa [#allocation5], 0 }
  0x1b   :  { %35 = vsyncpa [#allocation5 + $0x1], 0 }
  0x1c   :  { %36 = vsyncpa [#allocation14], 0 }
  0x1d   :  { %38 = vsyncpa [#allocation14 + $0x1], 0  ;;  %s3527_s27 = smov 0   ;;  %s3529_s28 = smov 0  }
  0x1e   :  { %s3531_s29 = smov 0   ;;  %s3533_s30 = smov 0  }
  0x1f   :  { %s3535_s0 = smov 0   ;;  %s3537_s19 = smov 0  }
  0x20   :  { %s3539_s1 = smov 0   ;;  %s3541_s20 = smov 0  }
  0x21   :  { %s3543_s21 = smov 0   ;;  %s3545_s22 = smov 0  }
  0x22   :  { %s3547_s2 = smov 0   ;;  %s3549_s23 = smov 0  }
  0x23   :  { %s3551_s24 = smov 0   ;;  %s3553_s25 = smov 0  }
  0x24 LB: > { %4366 = sst [smem:[#allocation20_spill]] %s3358_s27  ;;  %s53_s26 = sadd.s32 1, %s3402_s23  ;;  %s3410_s25 = sphi %s3553_s25, %s44_s25   ;;  %s3406_s24 = sphi %s3551_s24, %s4474_s24   ;;  %s3402_s23 = sphi %s3549_s23, %s4473_s23   ;;  %s3398_s2 = sphi %s3547_s2, %s4472_s2   ;;  %s3394_s22 = sphi %s3545_s22, %s4471_s22   ;;  %s3390_s21 = sphi %s3543_s21, %s4470_s21   ;;  %s3386_s20 = sphi %s3541_s20, %s4469_s20   ;;  %s3382_s1 = sphi %s3539_s1, %s4468_s1   ;;  %s3378_s19 = sphi %s3537_s19, %s4467_s19   ;;  %s3374_s0 = sphi %s3535_s0, %s4466_s0   ;;  %s3370_s30 = sphi %s3533_s30, %s4465_s30   ;;  %s3366_s29 = sphi %s3531_s29, %s4464_s29   ;;  %s3362_s28 = sphi %s3529_s28, %s4476_s28   ;;  %s3358_s27 = sphi %s3527_s27, %s4475_s27  }
  0x25   : > { %4367 = sst [smem:[#allocation21_spill]] %s3366_s29  ;;  %p4314_p0 = scmp.eq.s32.totalorder %s3410_s25, 0 }
  0x26   : > { %4368 = sst [smem:[#allocation22_spill]] %s3374_s0  ;;  %p3599_p1 = scmp.ge.s32.totalorder %s53_s26, 2 }
  0x27   : > { %4369 = sst [smem:[#allocation23_spill]] %s3378_s19  ;;  %s167_s17 = sadd.s32 1, %s3378_s19 }
  0x28   : > { %4370 = sst [smem:[#allocation24_spill]] %s3382_s1  ;;  %p174_p2 = scmp.ne.s32.totalorder %s3378_s19, %s3374_s0 }
  0x29   : > { %4371 = sst [smem:[#allocation25_spill]] %s3386_s20  ;;  %s4478_s26 = smov (%p3599_p1, %s53_s26), 0 }
  0x2a   : > { %4372 = sst [smem:[#allocation26_spill]] %s3390_s21  ;;  %p176_p4 = por %p174_p2, %p4314_p0 }
  0x2b   : > { %4373 = sst [smem:[#allocation27_spill]] %s3394_s22  ;;  %p4313_p5 = scmp.lt.s32.totalorder %s3410_s25, 4 }
  0x2c   : > { %4374 = sst [smem:[#allocation28_spill]] %s3398_s2  ;;  %s3616_s2 = ssub.s32 %s3402_s23, %s4478_s26 }
  0x2d   : > { %4375 = sst [smem:[#allocation29_spill]] %s3402_s23  ;;  %p165_p6 = scmp.eq.s32.totalorder %s3616_s2, 0 }
  0x2e   : > { %4376 = sst [smem:[#allocation30_spill]] %s3406_s24  ;;  %s4315_s16 = sand.u32 1, %s3410_s25  }
  0x2f   : > { %4377 = sst [smem:[#allocation31_spill]] %s3410_s25  ;;  %s3622_s14 = sand.u32 1, %s3378_s19  }
  0x30   : > { %s4378_s18 = scalar_select %p3599_p1, 1, 0 }
  0x31   : > { %4379 = sst [smem:[#allocation32_spill]] %s4478_s26  ;;  %s3628_s15 = sshll.u32 %s3402_s23, 4 }
  0x32   : > { %s3625_s13 = scalar_select %p165_p6, %s3378_s19, %s167_s17  }
  0x33   : > { %s4381_s4 = sld [smem:[#allocation46_spill]]  ;;  %s605_s26 = scalar_lea.vmem [#allocation6], %s3622_s14 }
  0x34   : > { %4380 = sst [smem:[#allocation33_spill]] %s3625_s13  ;;  %s612_s7 = sshll.u32 %s605_s26, 4  ;;  %s3637_s7 = int_to_ptr.vmem [resolvable:$true] %s612_s7 }
  0x35   : > { %p3641_p7 = pnand %p4313_p5, %p176_p4  ;;  %s3649_s11 = scalar_lea.sflag [#allocation7], %s4315_s16 }
  0x37   : > { %s4382_s17 = scalar_select %p3641_p7, 1, 0 }
  0x38   : > { %p3655_p11 = pneg %p3641_p7 }
  0x39   : > { %s3634_s10 = scalar_lea.hbm %s4381_s4, %s3628_s15  ;;  %s3079_s19 = scalar_lea.hbm %s4381_s4, 32 }
  0x3a   : > { %s3074_s12 = scalar_lea.hbm %s3634_s10, 16  ;;  %p3080_p2 = scmp.lt.u32.totalorder %s3634_s10, %s4381_s4 }
  0x3b   : > { %p3075_p10 = scmp.ne.s32.totalorder %s3634_s10, %s3074_s12  ;;  %p3081_p4 = scmp.lt.u32.totalorder %s3079_s19, %s3074_s12 }
  0x3c   : > { %p3083_p5 = scmp.lt.u32.totalorder %s3074_s12, %s3634_s10 }
  0x3d   : > { %p3077_p12 = pnand %p3655_p11, %p3075_p10  ;;  %p3082_p6 = por %p3081_p4, %p3080_p2 }
  0x3f   : > { %p3078_p13 = pneg %p3077_p12  ;;  %p3084_p3 = por %p3083_p5, %p3082_p6 }
  0x41   : > { %p3085_p0 = pnand %p3084_p3, %p3078_p13 }
  0x43   : > { %3088 = shalt.err (!%p3085_p0)
}
  0x44   : > { %s3089_s16 = scalar_lea.vmem %s3637_s7, 16  ;;  %s3412_s13 = smov [#allocation6]  }
  0x45   : > { %p3090_p10 = scmp.ne.s32.totalorder %s3637_s7, %s3089_s16  ;;  %s3094_s26 = sshll.u32 %s3412_s13, 4  ;;  %s3095_s26 = int_to_ptr.vmem [resolvable:$false] %s3094_s26 }
  0x46   : > { %s3096_s3 = scalar_lea.vmem %s3095_s26, 32  ;;  %p3097_p9 = scmp.lt.s32.totalorder %s3637_s7, %s3095_s26 }
  0x47   : > { %p3092_p12 = pnand %p3090_p10, %p3655_p11  ;;  %p3098_p1 = scmp.lt.s32.totalorder %s3096_s3, %s3089_s16 }
  0x49   : > { %p3093_p8 = pneg %p3092_p12  ;;  %p3099_p2 = por %p3098_p1, %p3097_p9 }
  0x4b   : > { %p3100_p4 = pnand %p3099_p2, %p3093_p8 }
  0x4d   : > { %3103 = shalt.err (!%p3100_p4)
}
  0x4e   : > { %2908 = dma.hbm_to_vmem [thread:$0]  (!%p3641_p7), %s3634_s10, 16, %s3637_s7, %s3649_s11  }
  0x4f   : > { %p4384_p0 = scmp.lt.s32.totalorder %s3410_s25, 5  ;;  %p4385_p3 = scmp.ge.s32.totalorder %s3410_s25, 1 }
  0x50   : > { %s4388_s8 = sld [smem:[#allocation50_spill]]  ;;  %s655_s13 = scalar_lea.vmem [#allocation9], %s3622_s14 }
  0x51   : > { %p3683_p5 = pnand %p4385_p3, %p4384_p0  ;;  %s662_s26 = sshll.u32 %s655_s13, 4  ;;  %s663_s26 = int_to_ptr.vmem [resolvable:$true] %s662_s26 }
  0x52   : > { %s4389_s3 = sand.u32 1, %s3410_s25  }
  0x53   : > { %s4386_s5 = scalar_select %p3683_p5, 1, 0 }
  0x54   : > { %s3696_s7 = scalar_lea.sflag [#allocation10], %s4389_s3 }
  0x55   : > { %4387 = sst [smem:[#allocation34_spill]] %s4386_s5 }
  0x56   : > { %s3691_s12 = scalar_lea.hbm %s4388_s8, %s3628_s15  ;;  %s3109_s16 = scalar_lea.hbm %s4388_s8, 32 }
  0x57   : > { %s3104_s10 = scalar_lea.hbm %s3691_s12, 16  ;;  %p3110_p13 = scmp.lt.u32.totalorder %s3691_s12, %s4388_s8 }
  0x58   : > { %p3105_p1 = scmp.ne.s32.totalorder %s3691_s12, %s3104_s10  ;;  %p3111_p6 = scmp.lt.u32.totalorder %s3109_s16, %s3104_s10 }
  0x59   : > { %p3113_p12 = scmp.lt.u32.totalorder %s3104_s10, %s3691_s12 }
  0x5a   : > { %p3107_p8 = pnand %p3105_p1, %p3655_p11  ;;  %p3112_p10 = por %p3111_p6, %p3110_p13 }
  0x5c   : > { %p3108_p9 = pneg %p3107_p8  ;;  %p3114_p2 = por %p3113_p12, %p3112_p10 }
  0x5e   : > { %p3115_p4 = pnand %p3114_p2, %p3108_p9 }
  0x60   : > { %3118 = shalt.err (!%p3115_p4)
}
  0x61   : > { %s3119_s13 = scalar_lea.vmem %s663_s26, 16  ;;  %s3413_s3 = smov [#allocation9]  }
  0x62   : > { %p3120_p0 = scmp.ne.s32.totalorder %s663_s26, %s3119_s13  ;;  %s3124_s9 = sshll.u32 %s3413_s3, 4  ;;  %s3125_s9 = int_to_ptr.vmem [resolvable:$false] %s3124_s9 }
  0x63   : > { %s3126_s4 = scalar_lea.vmem %s3125_s9, 32  ;;  %p3127_p8 = scmp.lt.s32.totalorder %s663_s26, %s3125_s9 }
  0x64   : > { %p3122_p3 = pnand %p3120_p0, %p3655_p11  ;;  %p3128_p5 = scmp.lt.s32.totalorder %s3126_s4, %s3119_s13 }
  0x66   : > { %p3123_p1 = pneg %p3122_p3  ;;  %p3129_p7 = por %p3128_p5, %p3127_p8 }
  0x68   : > { %p3130_p6 = pnand %p3129_p7, %p3123_p1 }
  0x6a   : > { %3133 = shalt.err (!%p3130_p6)
}
  0x6b   : > { %p4390_p13 = scmp.ne.s32.totalorder %s4382_s17, 0  ;;  %s3717_s9 = sadd.s32 4294967295, %s3410_s25  }
  0x6c   : > { %s2629_s22 = sadd.s32 4294967294, %s3410_s25   ;;  %s56_s5 = sadd.s32 1, %s3406_s24 }
  0x6d   : > { %2914 = dma.hbm_to_vmem [thread:$0]  (!%p4390_p13), %s3691_s12, 16, %s663_s26, %s3696_s7  }
  0x6e   : > { %p4391_p7 = scmp.ne.s32.totalorder %s4378_s18, 0  ;;  %s63_s10 = sadd.s32 1, %s3390_s21 }
  0x6f   : > { %p70_p5 = scmp.ne.s32.totalorder %s3390_s21, %s3386_s20  ;;  %p4322_p10 = scmp.ne.s32.totalorder %s3386_s20, %s3382_s1 }
  0x70   : > { %s4480_s5 = smov (!%p4391_p7, %s56_s5), %s3406_s24  ;;  %p4392_p12 = scmp.eq.s32.totalorder %s3410_s25, 0 }
  0x71   : > { %p58_p9 = scmp.ge.s32.totalorder %s4480_s5, 2  ;;  %p77_p4 = scmp.eq.s32.totalorder %s3717_s9, 0 }
  0x72   : > { %p3734_p2 = por %p4392_p12, %p70_p5  ;;  %p4396_p3 = scmp.ne.s32.totalorder %s3374_s0, %s3370_s30 }
  0x73   : > { %s4482_s5 = smov (%p58_p9, %s4480_s5), 0  ;;  %p3744_p0 = por %p77_p4, %p4322_p10 }
  0x74   : > { %4394 = sst [smem:[#allocation35_spill]] %s4482_s5  ;;  %p3751_p1 = por %p4396_p3, %p77_p4 }
  0x75   : > { %s4395_s18 = scalar_select %p3744_p0, 1, 0 }
  0x76   : > { %s4397_s26 = scalar_select %p3751_p1, 1, 0 }
  0x77   : > { %s60_s16 = ssub.s32 %s3406_s24, %s4482_s5  ;;  %s487_s19 = sadd.s32 1, %s3366_s29 }
  0x78   : > { %p61_p8 = scmp.eq.s32.totalorder %s60_s16, 0  ;;  %s484_s13 = sor.u32 %s3616_s2, %s60_s16 }
  0x79   : > { %p485_p6 = scmp.eq.s32.totalorder %s484_s13, 0  ;;  %p497_p7 = scmp.ne.s32.totalorder %s3366_s29, %s3362_s28 }
  0x7a   : > { %s3762_s3 = scalar_select %p61_p8, %s3390_s21, %s63_s10  }
  0x7b   : > { %s3765_s4 = scalar_select %p485_p6, %s3366_s29, %s487_s19  }
  0x7c   : > { %4398 = sst [smem:[#allocation36_spill]] %s3762_s3  ;;  %p498_p9 = scmp.eq.s32.totalorder %s3717_s9, 3 }
  0x7d   : > { %4399 = sst [smem:[#allocation37_spill]] %s3765_s4  ;;  %p503_p12 = scmp.ne.s32.totalorder %s3362_s28, %s3358_s27 }
  0x7e   : > { %p504_p4 = scmp.eq.s32.totalorder %s2629_s22, 3  ;;  %s562_s30 = sand.u32 1, %s3390_s21  }
  0x7f   : > { %p3771_p3 = por %p498_p9, %p497_p7  ;;  %p3778_p10 = por %p498_p9, %p70_p5 }
  0x80   : > { %p3782_p8 = por %p504_p4, %p503_p12  ;;  %p4406_p6 = scmp.ne.s32.totalorder %s3386_s20, %s3382_s1 }
  0x81   : > { %s4400_s8 = scalar_select %p3771_p3, 1, 0 }
  0x82   : > { %s4402_s2 = scalar_select %p3778_p10, 1, 0 }
  0x83   : > { %4401 = sst [smem:[#allocation38_spill]] %s4400_s8  ;;  %p3789_p1 = por %p504_p4, %p4406_p6 }
  0x84   : > { %4403 = sst [smem:[#allocation39_spill]] %s4402_s2  ;;  %s2632_s22 = sshll.u32 %s562_s30, 3 }
  0x85   : > { %s4404_s10 = scalar_select %p3782_p8, 1, 0 }
  0x86   : > { %s4407_s16 = scalar_select %p3789_p1, 1, 0 }
  0x87   : > { %4405 = sst [smem:[#allocation40_spill]] %s4404_s10  ;;  %s2633_s19 = sshll.u32 %s3406_s24, 7 }
  0x88   : > { %4408 = sst [smem:[#allocation41_spill]] %s4407_s16  ;;  %s566_s21 = scalar_lea.vmem [#allocation3], %s2632_s22 }
  0x89   : > { %s4409_s3 = sld [smem:[#allocation42_spill]]  ;;  %s573_s29 = sshll.u32 %s566_s21, 4  ;;  %s3799_s29 = int_to_ptr.vmem [resolvable:$true] %s573_s29 }
  0x8a   : > { %p4410_p5 = scmp.lt.s32.totalorder %s3410_s25, 4  ;;  %s4412_s6 = sld [smem:[#allocation48_spill]] }
  0x8b   : > { %s563_s21 = scalar_lea.sflag [#allocation4], %s562_s30 }
  0x8c   : > { %p3805_p7 = pnand %p4410_p5, %p3734_p2 }
  0x8e   : > { %p3136_p12 = pneg %p3805_p7 }
  0x8f   : > { %s3797_s4 = scalar_lea.hbm %s4409_s3, %s2633_s19  ;;  %s630_s19 = scalar_lea.vmem [#allocation8], %s3622_s14 }
  0x90   : > { %s3813_s5 = scalar_lea.hbm %s4412_s6, %s3628_s15  ;;  %s3816_s13 = sshll.u32 %s630_s19, 4  ;;  %s638_s13 = int_to_ptr.vmem [resolvable:$true] %s3816_s13 }
  0x91   : > { %s3134_s22 = scalar_lea.hbm %s3797_s4, 128  ;;  %s3139_s24 = scalar_lea.hbm %s4409_s3, 256 }
  0x92   : > { %p3135_p9 = scmp.ne.s32.totalorder %s3797_s4, %s3134_s22  ;;  %p3140_p6 = scmp.lt.u32.totalorder %s3797_s4, %s4409_s3 }
  0x93   : > { %p3141_p5 = scmp.lt.u32.totalorder %s3139_s24, %s3134_s22  ;;  %p3143_p8 = scmp.lt.u32.totalorder %s3134_s22, %s3797_s4 }
  0x94   : > { %p3137_p2 = pnand %p3136_p12, %p3135_p9 }
  0x95   : > { %p3142_p1 = por %p3141_p5, %p3140_p6 }
  0x96   : > { %p3138_p4 = pneg %p3137_p2 }
  0x97   : > { %p3144_p10 = por %p3143_p8, %p3142_p1 }
  0x99   : > { %p3145_p3 = pnand %p3144_p10, %p3138_p4 }
  0x9b   : > { %3148 = shalt.err (!%p3145_p3)
}
  0x9c   : > { %s3149_s30 = scalar_lea.vmem %s3799_s29, 128  ;;  %s3414_s10 = smov [#allocation3]  }
  0x9d   : > { %p3150_p9 = scmp.ne.s32.totalorder %s3799_s29, %s3149_s30  ;;  %s3154_s19 = sshll.u32 %s3414_s10, 4  ;;  %s3155_s19 = int_to_ptr.vmem [resolvable:$false] %s3154_s19 }
  0x9e   : > { %s3156_s27 = scalar_lea.vmem %s3155_s19, 256  ;;  %p3157_p13 = scmp.lt.s32.totalorder %s3799_s29, %s3155_s19 }
  0x9f   : > { %p3152_p2 = pnand %p3150_p9, %p3136_p12  ;;  %p3158_p6 = scmp.lt.s32.totalorder %s3156_s27, %s3149_s30 }
  0xa1   : > { %p3153_p0 = pneg %p3152_p2  ;;  %p3159_p5 = por %p3158_p6, %p3157_p13 }
  0xa3   : > { %p3160_p1 = pnand %p3159_p5, %p3153_p0 }
  0xa5   : > { %3163 = shalt.err (!%p3160_p1)
}
  0xa6   : > { %2905 = dma.hbm_to_vmem [thread:$0]  (!%p3805_p7), %s3797_s4, 128, %s3799_s29, %s563_s21  }
  0xa7   : > { %s3164_s22 = scalar_lea.hbm %s3813_s5, 16  ;;  %s3169_s16 = scalar_lea.hbm %s4412_s6, 32 }
  0xa8   : > { %p3165_p10 = scmp.ne.s32.totalorder %s3813_s5, %s3164_s22  ;;  %p3170_p13 = scmp.lt.u32.totalorder %s3813_s5, %s4412_s6 }
  0xa9   : > { %p3171_p0 = scmp.lt.u32.totalorder %s3169_s16, %s3164_s22  ;;  %p3173_p4 = scmp.lt.u32.totalorder %s3164_s22, %s3813_s5 }
  0xaa   : > { %p3167_p3 = pnand %p3165_p10, %p3655_p11 }
  0xab   : > { %p3172_p12 = por %p3171_p0, %p3170_p13 }
  0xac   : > { %p3168_p8 = pneg %p3167_p3 }
  0xad   : > { %p3174_p9 = por %p3173_p4, %p3172_p12 }
  0xaf   : > { %p3175_p2 = pnand %p3174_p9, %p3168_p8 }
  0xb1   : > { %3178 = shalt.err (!%p3175_p2)
}
  0xb2   : > { %s3179_s29 = scalar_lea.vmem %s638_s13, 16  ;;  %s3415_s4 = smov [#allocation8]  }
  0xb3   : > { %p3180_p7 = scmp.ne.s32.totalorder %s638_s13, %s3179_s29  ;;  %s3184_s21 = sshll.u32 %s3415_s4, 4  ;;  %s3185_s21 = int_to_ptr.vmem [resolvable:$false] %s3184_s21 }
  0xb4   : > { %s3186_s10 = scalar_lea.vmem %s3185_s21, 32  ;;  %p3187_p1 = scmp.lt.s32.totalorder %s638_s13, %s3185_s21 }
  0xb5   : > { %p3182_p6 = pnand %p3180_p7, %p3655_p11  ;;  %p3188_p10 = scmp.lt.s32.totalorder %s3186_s10, %s3179_s29 }
  0xb7   : > { %p3183_p5 = pneg %p3182_p6  ;;  %p3189_p3 = por %p3188_p10, %p3187_p1 }
  0xb9   : > { %p3190_p0 = pnand %p3189_p3, %p3183_p5 }
  0xbb   : > { %3193 = shalt.err (!%p3190_p0)
}
  0xbc   : > { %p4413_p13 = scmp.ne.s32.totalorder %s4382_s17, 0  ;;  %s4414_s22 = sld [smem:[#allocation51_spill]] }
  0xbd   : > { %s672_s16 = scalar_lea.vmem [#allocation11], %s3622_s14 }
  0xbe   : > { %2911 = dma.hbm_to_vmem [thread:$0]  (!%p4413_p13), %s3813_s5, 16, %s638_s13, %s3649_s11  }
  0xbf   : > { %s679_s1 = sshll.u32 %s672_s16, 4  ;;  %s680_s1 = int_to_ptr.vmem [resolvable:$true] %s679_s1 }
  0xc2   : > { %s4415_s12 = smov %s4414_s22  ;;  %s3866_s24 = scalar_lea.hbm %s4414_s22, %s3628_s15 }
  0xc3   : > { %s3194_s30 = scalar_lea.hbm %s3866_s24, 16  ;;  %s3199_s11 = scalar_lea.hbm %s4415_s12, 32 }
  0xc4   : > { %p3195_p8 = scmp.ne.s32.totalorder %s3866_s24, %s3194_s30  ;;  %p3200_p9 = scmp.lt.u32.totalorder %s3866_s24, %s4415_s12 }
  0xc5   : > { %p3201_p2 = scmp.lt.u32.totalorder %s3199_s11, %s3194_s30  ;;  %p3203_p6 = scmp.lt.u32.totalorder %s3194_s30, %s3866_s24 }
  0xc6   : > { %p3197_p12 = pnand %p3195_p8, %p3655_p11 }
  0xc7   : > { %p3202_p7 = por %p3201_p2, %p3200_p9 }
  0xc8   : > { %p3198_p4 = pneg %p3197_p12 }
  0xc9   : > { %p3204_p5 = por %p3203_p6, %p3202_p7 }
  0xcb   : > { %p3205_p1 = pnand %p3204_p5, %p3198_p4 }
  0xcd   : > { %3208 = shalt.err (!%p3205_p1)
}
  0xce   : > { %s3209_s14 = scalar_lea.vmem %s680_s1, 16  ;;  %s3416_s15 = smov [#allocation11]  }
  0xcf   : > { %p3210_p10 = scmp.ne.s32.totalorder %s680_s1, %s3209_s14  ;;  %s3214_s21 = sshll.u32 %s3416_s15, 4  ;;  %s3215_s21 = int_to_ptr.vmem [resolvable:$false] %s3214_s21 }
  0xd0   : > { %s3216_s10 = scalar_lea.vmem %s3215_s21, 32  ;;  %p3217_p8 = scmp.lt.s32.totalorder %s680_s1, %s3215_s21 }
  0xd1   : > { %p3212_p3 = pnand %p3210_p10, %p3655_p11  ;;  %p3218_p12 = scmp.lt.s32.totalorder %s3216_s10, %s3209_s14 }
  0xd3   : > { %p3213_p0 = pneg %p3212_p3  ;;  %p3219_p13 = por %p3218_p12, %p3217_p8 }
  0xd5   : > { %p3220_p2 = pnand %p3219_p13, %p3213_p0 }
  0xd7   : > { %3223 = shalt.err (!%p3220_p2)
}
  0xd8   : > { %p4416_p9 = scmp.ne.s32.totalorder %s4382_s17, 0  ;;  %s4417_s19 = sld [smem:[#allocation34_spill]] }
  0xda   : > { %2917 = dma.hbm_to_vmem [thread:$0]  (!%p4416_p9), %s3866_s24, 16, %s680_s1, %s3696_s7  }
  0xde   : > { %p4418_p4 = scmp.ne.s32.totalorder %s4417_s19, 0 }
  0xdf   : > { %s3890_s23 = sand.u32 (!%p4418_p4), 1, %s3386_s20   ;;  %p4419_p11 = scmp.ne.s32.totalorder (!%p4418_p4), %s4395_s18, 0 }
  0xe0   : > { %706 = sbr.rel (%p4418_p4) target bundleno = 3317 (0xcf5), region = 88  ;;  %s4336_s27 = sshll.u32 (!%p4418_p4), %s3890_s23, 3 }
  0xe1   : > { %s709_s22 = scalar_lea.sflag (!%p4418_p4), [#allocation4], %s3890_s23  ;;  %s3896_s16 = scalar_lea.vmem (!%p4418_p4), [#allocation3], %s4336_s27 }
  0xe7   : > { %3337 = dma.done.wait (%p4419_p11), %s709_s22, 128  }
  0xe8   : > { %3339 = vsyncadd (%p4419_p11), %s709_s22, 4294967168  ;;  %s717_s17 = sand.u32 1, %s3717_s9   ;;  %s3904_s7 = sand.u32 1, %s3374_s0  }
  0xe9   : > { %s718_s24 = scalar_lea.sflag [#allocation7], %s717_s17  ;;  %p4420_p13 = scmp.ne.s32.totalorder %s4397_s26, 0 }
  0xeb   : > { %3341 = dma.done.wait (%p4420_p13), %s718_s24, 32  }
  0xec   : > { %3343 = vsyncadd (%p4420_p13), %s718_s24, 4294967264  ;;  %s734_s18 = scalar_lea.sflag [#allocation10], %s717_s17 }
  0xed   : > { %3345 = dma.done.wait (%p4420_p13), %s734_s18, 32  }
  0xee   : > { %3347 = vsyncadd (%p4420_p13), %s734_s18, 4294967264  ;;  %s4421_s9 = sld [smem:[#allocation27_spill]]  ;;  %s4335_s4 = sand.u32 1, %s3362_s28  }
  0xef   : > { %s2640_s11 = sshll.u32 %s4335_s4, 5  ;;  %s4423_s22 = sld [smem:[#allocation43_spill]] }
  0xf0   : > { %s4424_s4 = sld [smem:[#allocation45_spill]]  ;;  %s4425_s27 = sld [smem:[#allocation47_spill]] }
  0xf1   : > { %s4426_s13 = sld [smem:[#allocation49_spill]]  ;;  %s4427_s19 = sld [smem:[#allocation52_spill]] }
  0xf2   : > { %s4428_s24 = sld [smem:[#allocation53_spill]]  ;;  %s4429_s2 = sld [smem:[#allocation54_spill]] }
  0xf3   : > { %s3963_s30 = scalar_lea.vmem [#allocation12], %s2640_s11 }
  0xf4   : > { %p850_p7 = scmp.lt.s32.totalorder %s4421_s9, 1  ;;  %p2650_p6 = scmp.ne.s32.totalorder %s4421_s9, 0 }
  0xf5   : > { %v886_v0 = vld [vmem:[%s3896_s16] sm:$0xff] (!%p2650_p6)  ;;  %vm887_vm0 = vcmask (!%p2650_p6), 261120  }
  0xf6   : > { %s3922_s5 = scalar_select %p850_p7, %s4421_s9, 1 }
  0xf7   : > { %888 = vst.msk [vmem:[#allocation2] sm:$0xff] (!%p2650_p6), %vm887_vm0, %v886_v0 }
  0xf8   : > { %s2694_s26 = sshll.u32 %s3922_s5, 5  ;;  %s2697_s6 = sshll.u32 %s3922_s5, 6 }
  0xf9   : > { %s3932_s17 = scalar_lea.vmem %s4423_s22, %s2694_s26  ;;  %s3937_s29 = scalar_lea.vmem %s4424_s4, %s2694_s26 }
  0xfa   : > { %s3942_s3 = scalar_lea.vmem %s4425_s27, %s2694_s26  ;;  %s3948_s14 = scalar_lea.vmem %s4426_s13, %s2697_s6 }
  0xfb   : > { %s875_s22 = scalar_lea.vmem %s4427_s19, %s3922_s5  ;;  %s878_s4 = scalar_lea.vmem %s4428_s24, %s3922_s5 }
  0xfc   : > { %s881_s1 = scalar_lea.vmem %s4429_s2, %s3922_s5  ;;  %s744_s27 = scalar_lea.vmem [#allocation11], %s3904_s7 }
  0xfd   : > { %s4430_s26 = sshll.u32 %s3890_s23, 3  ;;  %885 = sbr.rel (%p2650_p6) target bundleno = 260 (0x104), region = 112 }
  0xfe   : > { %s3967_s8 = scalar_lea.vmem [#allocation13], %s4430_s26 }
 0x104 PF: > { %v3971_v1 = vld [vmem:[#allocation2] sm:$0xff]  ;;  %vm892_vm1 = vcmask 261120   ;;  %v922_v9 = vld [vmem:[%s3932_s17 + $0x8] sm:$0xff]  ;;  %v923_v10 = vld [vmem:[%s3932_s17 + $0x10] sm:$0xff]  ;;  %v3417_v11 = vmov 0.0|0.0   ;;  %vm3418_vm2 = vmmov 0   ;;  %v1012_v36 = vlaneseq }
 0x105   : > { %v893_v2 = vsel %vm892_vm1, %v3971_v1, 0.0  ;;  %v921_v8 = vld [vmem:[%s3932_s17] sm:$0xff]  ;;  %2858 = vmatprep.subr.bf16.mxu0 %v3417_v11  ;;  %v924_v13 = vld [vmem:[%s3932_s17 + $0x18] sm:$0xff]  ;;  %v3419_v14 = vmov 0.0   ;;  %s4432_s12 = sld [smem:[#allocation44_spill]]  ;;  %s3420_s9 = smov 104  }
 0x106   : > { %894 = vadd.xlane.f32.xlu0 %v893_v2  ;;  %v2859_v12 = vpack.c.bf16 %v922_v9, %v921_v8  ;;  %2754 = vmatprep.mubr.msk.f32.mxu0 %vm3418_vm2, %v3419_v14  ;;  %v2862_v15 = vpack.c.bf16 %v924_v13, %v923_v10  ;;  %v2651_v20 = vld [vmem:[%s744_s27] ss:$0 sm:$0xff]  ;;  %s3421_s11 = smov 120   ;;  %s3422_s21 = smov 112   ;;  %vm1019_vm3 = vcmask 64512   ;;  %v1013_v37 = vshrl.u32 %v1012_v36, 7 }
 0x107   : > { %2762 = vmatprep.subr.mxu1 %v3419_v14  ;;  %2764 = vmatprep.mubr.msk.f32.mxu1 %vm3418_vm2, %v3419_v14  ;;  %v2652_v22 = vld [vmem:[%s875_s22] ss:$0 sm:$0xff]  ;;  %s3423_s17 = smov 96   ;;  %v1015_v38 = vand.u32 127, %v1012_v36  ;;  %s3424_s13 = smov 64   ;;  %v2672_v36 = vld [vmem:[%s3937_s29 + $0x18] sm:$0xff] }
 0x108   : > { %2860 = vmatpush3.bf16.msra.mxu0 %v2859_v12  ;;  %s4437_s18 = scalar_lea.vmem [#allocation8], %s3904_s7  ;;  %vm2123_vm5 = vcmask 523264  }
 0x109   : > { %2861 = vmatprep.subr.bf16.mxu0 %v3417_v11  ;;  %vm1016_vm4 = vcmp.le.s32.totalorder %v1015_v38, %v1013_v37 }
 0x10b   : > { %s4433_s16 = scalar_lea.vmem %s4432_s12, %s3922_s5  ;;  %s4439_s5 = sld [smem:[#allocation27_spill]] }
 0x10c   : > { %2863 = vmatpush3.bf16.msra.mxu0 %v2862_v15  ;;  %v2653_v25 = vld [vmem:[%s4433_s16] ss:$0 sm:$0xff] }
 0x10d   : > { %2757 = vmatprep.subr.mxu0 %v3419_v14 }
 0x111   : > { %p2681_p5 = scmp.ne.s32.totalorder %s4439_s5, 1 }
 0x112   : > { %vm3426_vm6 = vmmov (!%p2681_p5), 0  }
 0x193   : > { %v895_v3 = vpop.xlane.xlu0 %894 }
 0x194   : > { %v897_v4 = vmul.f32 0.03125, %v895_v3 }
 0x196   : > { %v898_v5 = vsub.f32 %v3971_v1, %v897_v4 }
 0x198   : > { %v899_v6 = vmul.f32 %v898_v5, %v898_v5 }
 0x19a   : > { %v900_v7 = vsel %vm892_vm1, %v899_v6, 0.0 }
 0x19b   : > { %901 = vadd.xlane.f32.xlu0 %v900_v7 }
 0x228   : > { %v902_v16 = vpop.xlane.xlu0 %901 }
 0x229   : > { %v903_v17 = vmul.f32 0.03125, %v902_v16 }
 0x22b   : > { %v904_v18 = vadd.f32 1e-05, %v903_v17 }
 0x22d   : > { %3052 = vrsqrt.f32 %v904_v18 }
 0x237   : > { %v3053_v19 = vpop.eup %3052 }
 0x238   : > { %v906_v21 = vmul.f32 %v3053_v19, %v898_v5 }
 0x23a   : > { %v913_v23 = vmul.f32 %v2651_v20, %v906_v21 }
 0x23c   : > { %v920_v24 = vadd.f32 %v2652_v22, %v913_v23 }
 0x23e   : > { %2755 = vmatmul.mubr.msk.f32.vlgmr.msra.gmra.mrb[0].mxu0 %vm892_vm1, %v920_v24 }
 0x23f   : > { %2759 = vmatprep.mubr.msk.f32.mxu0 %vm3418_vm2, %v3419_v14 }
 0x311   : > { %v1001_v26 = vpop.f32.mrb[0].mxu0 }
 0x312   : > { %v4004_v27 = vadd.f32 %v2653_v25, %v1001_v26  ;;  %v2756_v28 = vpop.f32.mrb[1].mxu0 }
 0x314   : > { %1010 = vrot.lane.b32.xlu0 %v4004_v27, %s3420_s9  ;;  %1006 = vrot.lane.b32.xlu1 %v4004_v27, %s3421_s11  ;;  %s4442_s9 = sld [smem:[#allocation55_spill]] (!%p2681_p5) }
 0x318   : > { %1008 = vrot.lane.b32.xlu1 %v4004_v27, %s3422_s21 }
 0x31c   : > { %1017 = vrot.lane.b32.xlu1 %v4004_v27, %s3423_s17 }
 0x386   : > { %v4010_v29 = vpop.permute.xlu1 %1006  ;;  %v4016_v31 = vpop.permute.xlu0 %1010 }
 0x387   : > { %1094 = vrot.lane.b32.xlu1 %v4010_v29, %s3423_s17 }
 0x38a   : > { %v4013_v30 = vpop.permute.xlu1 %1008 }
 0x38b   : > { %1170 = vrot.lane.b32.xlu1 %v4013_v30, %s3423_s17 }
 0x38e   : > { %v1018_v32 = vpop.permute.xlu1 %1017 }
 0x38f   : > { %1246 = vrot.lane.b32.xlu1 %v4016_v31, %s3423_s17  ;;  %2758 = vmatpush3.xpose.msk.msra.mxu0 %vm1019_vm3, %v1018_v32  ;;  %s4443_s17 = sld [smem:[#allocation56_spill]] (!%p2681_p5) }
 0x390   : > { %2767 = vmatprep.subr.mxu0 %v3419_v14 }
 0x392   : > { %2760 = vmatmul.mubr.msk.f32.vlgmr.msra.gmra.mrb[2].mxu0 %vm1019_vm3, %v4004_v27 }
 0x393   : > { %2769 = vmatprep.mubr.msk.f32.mxu0 %vm3418_vm2, %v3419_v14 }
 0x3f9   : > { %v1095_v33 = vpop.permute.xlu1 %1094 }
 0x3fa   : > { %2763 = vmatpush3.xpose.msk.msra.mxu1 %vm1019_vm3, %v1095_v33 }
 0x3fb   : > { %2772 = vmatprep.subr.mxu1 %v3419_v14 }
 0x3fd   : > { %2765 = vmatmul.mubr.msk.f32.vlgmr.msra.gmra.mrb[0].mxu1 %vm1019_vm3, %v4010_v29  ;;  %v1171_v34 = vpop.permute.xlu1 %1170 }
 0x3fe   : > { %2768 = vmatpush3.xpose.msk.msra.mxu0 %vm1019_vm3, %v1171_v34  ;;  %2774 = vmatprep.mubr.msk.f32.mxu1 %vm3418_vm2, %v3419_v14  ;;  %v1684_v34 = vld [vmem:[%s3937_s29] sm:$0xff] }
 0x3ff   : > { %2777 = vmatprep.subr.mxu0 %v3419_v14 }
 0x401   : > { %2770 = vmatmul.mubr.msk.f32.vlgmr.msra.gmra.mrb[4].mxu0 %vm1019_vm3, %v4013_v30  ;;  %v1247_v35 = vpop.permute.xlu1 %1246 }
 0x402   : > { %2773 = vmatpush3.xpose.msk.msra.mxu1 %vm1019_vm3, %v1247_v35  ;;  %2779 = vmatprep.mubr.msk.f32.mxu0 %vm3418_vm2, %v3419_v14  ;;  %v2667_v35 = vld [vmem:[%s3937_s29 + $0x8] sm:$0xff] }
 0x403   : > { %2782 = vmatprep.subr.mxu1 %v3419_v14 }
 0x405   : > { %2775 = vmatmul.mubr.msk.f32.vlgmr.msra.gmra.mrb[2].mxu1 %vm1019_vm3, %v4016_v31 }
 0x406   : > { %2784 = vmatprep.mubr.msk.f32.mxu1 %vm3418_vm2, %v3419_v14 }
 0x465   : > { %v1090_v39 = vpop.f32.mrb[2].mxu0 }
 0x466   : > { %v1322_v40 = vmul.f32 0.35355338, %v1090_v39  ;;  %v2761_v41 = vpop.f32.mrb[3].mxu0  ;;  %v2670_v39 = vld [vmem:[%s3937_s29 + $0x10] sm:$0xff]  ;;  %s4434_s29 = scalar_lea.vmem [#allocation6], %s3904_s7 }
 0x468   : > { %v1328_v42 = vsel %vm1016_vm4, %v1322_v40, -1e+09 }
 0x469   : > { %v1332_v43 = vsel %vm1019_vm3, %v1328_v42, -inf }
 0x46a   : > { %1333 = vmax.xlane.f32.xlu1 %v1332_v43 }
 0x4d0   : > { %v1166_v44 = vpop.f32.mrb[0].mxu1 }
 0x4d1   : > { %v1323_v45 = vmul.f32 0.35355338, %v1166_v44  ;;  %v2766_v46 = vpop.f32.mrb[1].mxu1 }
 0x4d3   : > { %v1329_v47 = vsel %vm1016_vm4, %v1323_v45, -1e+09 }
 0x4d4   : > { %v1242_v48 = vpop.f32.mrb[4].mxu0  ;;  %v1335_v49 = vsel %vm1019_vm3, %v1329_v47, -inf }
 0x4d5   : > { %v1324_v50 = vmul.f32 0.35355338, %v1242_v48  ;;  %1336 = vmax.xlane.f32.xlu0 %v1335_v49  ;;  %v2771_v51 = vpop.f32.mrb[5].mxu0 }
 0x4d7   : > { %v1330_v52 = vsel %vm1016_vm4, %v1324_v50, -1e+09 }
 0x4d8   : > { %v1318_v53 = vpop.f32.mrb[2].mxu1  ;;  %v1338_v54 = vsel %vm1019_vm3, %v1330_v52, -inf }
 0x4d9   : > { %v1325_v55 = vmul.f32 0.35355338, %v1318_v53  ;;  %v2776_v56 = vpop.f32.mrb[3].mxu1  ;;  %1339 = vmax.xlane.f32.xlu1 %v1338_v54 }
 0x4db   : > { %v1331_v57 = vsel %vm1016_vm4, %v1325_v55, -1e+09 }
 0x4dc   : > { %v1341_v58 = vsel %vm1019_vm3, %v1331_v57, -inf }
 0x4dd   : > { %1342 = vmax.xlane.f32.xlu0 %v1341_v58 }
 0x4ea   : > { %1380 = vrot.lane.b32.xlu1 %v4004_v27, %s3424_s13 }
 0x4f7   : > { %v1334_v59 = vpop.xlane.xlu1 %1333 }
 0x4f8   : > { %v1344_v60 = vsub.f32 %v1328_v42, %v1334_v59 }
 0x4fa   : > { %v1348_v61 = vmul.f32 1.442695, %v1344_v60 }
 0x4fc   : > { %3054 = vpow2.f32 %v1348_v61 }
 0x506   : > { %v3055_v62 = vpop.eup %3054 }
 0x507   : > { %v1356_v63 = vsel %vm1019_vm3, %v3055_v62, 0.0 }
 0x50e   : > { %1357 = vadd.xlane.f32.xlu1 %v1356_v63 }
 0x562   : > { %v1337_v0 = vpop.xlane.xlu0 %1336 }
 0x563   : > { %v1345_v2 = vsub.f32 %v1329_v47, %v1337_v0 }
 0x565   : > { %v1350_v3 = vmul.f32 1.442695, %v1345_v2  ;;  %v2023_v2 = vld [vmem:[%s3942_s3] sm:$0xff] }
 0x566   : > { %v1340_v4 = vpop.xlane.xlu1 %1339 }
 0x567   : > { %3056 = vpow2.f32 %v1350_v3  ;;  %v1346_v5 = vsub.f32 %v1330_v52, %v1340_v4  ;;  %v2024_v3 = vld [vmem:[%s3942_s3 + $0x8] sm:$0xff]  ;;  %v2025_v4 = vld [vmem:[%s3942_s3 + $0x10] sm:$0xff] }
 0x569   : > { %v1352_v6 = vmul.f32 1.442695, %v1346_v5  ;;  %v2026_v5 = vld [vmem:[%s3942_s3 + $0x18] sm:$0xff]  ;;  %s4444_s3 = sld [smem:[#allocation58_spill]] (!%p2681_p5) }
 0x56a   : > { %v1343_v7 = vpop.xlane.xlu0 %1342  ;;  %v1381_v8 = vpop.permute.xlu1 %1380 }
 0x56b   : > { %3058 = vpow2.f32 %v1352_v6  ;;  %v1347_v9 = vsub.f32 %v1331_v57, %v1343_v7  ;;  %2778 = vmatpush3.msra.mxu0 %v1381_v8  ;;  %v2674_v57 = vld [vmem:[%s4434_s29] ss:$0 sm:$0xff]  ;;  %v2868_v6 = vpack.c.bf16 %v2026_v5, %v2025_v4  ;;  %v2109_v8 = vld [vmem:[%s3948_s14 + $0x8] sm:$0xff] }
 0x56c   : > { %2787 = vmatprep.subr.mxu0 %v3419_v14  ;;  %v2108_v7 = vld [vmem:[%s3948_s14] sm:$0xff] }
 0x56d   : > { %v1354_v10 = vmul.f32 1.442695, %v1347_v9  ;;  %v2110_v9 = vld [vmem:[%s3948_s14 + $0x10] sm:$0xff] }
 0x56f   : > { %3060 = vpow2.f32 %v1354_v10  ;;  %v2871_v10 = vpack.c.bf16 %v2109_v8, %v2108_v7 }
 0x571   : > { %v3057_v12 = vpop.eup %3056 }
 0x572   : > { %v1359_v13 = vsel %vm1019_vm3, %v3057_v12, 0.0 }
 0x573   : > { %1360 = vadd.xlane.f32.xlu0 %v1359_v13 }
 0x575   : > { %v3059_v15 = vpop.eup %3058 }
 0x576   : > { %v1362_v16 = vsel %vm1019_vm3, %v3059_v15, 0.0 }
 0x577   : > { %1363 = vadd.xlane.f32.xlu1 %v1362_v16  ;;  %v2113_v16 = vld [vmem:[%s3948_s14 + $0x28] sm:$0xff] }
 0x579   : > { %v3061_v17 = vpop.eup %3060 }
 0x57a   : > { %v1365_v18 = vsel %vm1019_vm3, %v3061_v17, 0.0 }
 0x57b   : > { %1366 = vadd.xlane.f32.xlu0 %v1365_v18 }
 0x588   : > { %1532 = vrot.lane.b32.xlu1 %v4013_v30, %s3424_s13 }
 0x58c   : > { %1608 = vrot.lane.b32.xlu1 %v4016_v31, %s3424_s13 }
 0x591   : > { %1456 = vrot.lane.b32.xlu0 %v4010_v29, %s3424_s13 }
 0x59b   : > { %v1358_v19 = vpop.xlane.xlu1 %1357 }
 0x59c   : > { %3062 = vrcp.f32 %v1358_v19 }
 0x5a6   : > { %v3063_v20 = vpop.eup %3062 }
 0x5a7   : > { %v1369_v21 = vmul.f32 %v3063_v20, %v3055_v62 }
 0x5a9   : > { %1376 = vst.msk [vmem:[%s3963_s30] sm:$0xff] %vm1019_vm3, %v1369_v21  ;;  %2780 = vmatmul.mubr.msk.f32.vlgmr.msra.gmra.mrb[6].mxu0 %vm1019_vm3, %v1369_v21 }
 0x5aa   : > { %2789 = vmatprep.mubr.msk.f32.mxu0 %vm3418_vm2, %v3419_v14 }
 0x600   : > { %v1361_v22 = vpop.xlane.xlu0 %1360 }
 0x601   : > { %3064 = vrcp.f32 %v1361_v22  ;;  %v2675_v22 = vld [vmem:[%s878_s4] ss:$0 sm:$0xff]  ;;  %s4438_s4 = scalar_lea.vmem [#allocation9], %s3904_s7 }
 0x604   : > { %v1364_v23 = vpop.xlane.xlu1 %1363 }
 0x605   : > { %3066 = vrcp.f32 %v1364_v23 }
 0x608   : > { %v1367_v24 = vpop.xlane.xlu0 %1366  ;;  %v1533_v25 = vpop.permute.xlu1 %1532 }
 0x609   : > { %3068 = vrcp.f32 %v1367_v24  ;;  %2788 = vmatpush3.msra.mxu0 %v1533_v25  ;;  %v2676_v24 = vld [vmem:[%s881_s1] ss:$0 sm:$0xff]  ;;  %s4440_s1 = sld [smem:[#allocation57_spill]] (!%p2681_p5) }
 0x60a   : > { %2797 = vmatprep.subr.mxu0 %v3419_v14 }
 0x60b   : > { %v3065_v26 = vpop.eup %3064 }
 0x60c   : > { %v1371_v27 = vmul.f32 %v3065_v26, %v3057_v12  ;;  %v1457_v28 = vpop.permute.xlu0 %1456  ;;  %v1609_v29 = vpop.permute.xlu1 %1608  ;;  %v2111_v12 = vld [vmem:[%s3948_s14 + $0x18] sm:$0xff]  ;;  %v2114_v26 = vld [vmem:[%s3948_s14 + $0x30] sm:$0xff] }
 0x60d   : > { %2783 = vmatpush3.msra.mxu1 %v1457_v28  ;;  %v2874_v13 = vpack.c.bf16 %v2111_v12, %v2110_v9 }
 0x60e   : > { %1377 = vst.msk [vmem:[%s3963_s30 + $0x8] sm:$0xff] %vm1019_vm3, %v1371_v27  ;;  %2785 = vmatmul.mubr.msk.f32.vlgmr.msra.gmra.mrb[4].mxu1 %vm1019_vm3, %v1371_v27  ;;  %2792 = vmatprep.subr.mxu1 %v3419_v14  ;;  %v2115_v27 = vld [vmem:[%s3948_s14 + $0x38] sm:$0xff] }
 0x60f   : > { %v3067_v30 = vpop.eup %3066  ;;  %2793 = vmatpush3.msra.mxu1 %v1609_v29  ;;  %2794 = vmatprep.mubr.msk.f32.mxu1 %vm3418_vm2, %v3419_v14  ;;  %v2880_v28 = vpack.c.bf16 %v2115_v27, %v2114_v26  ;;  %v2677_v29 = vld [vmem:[%s4437_s18] ss:$0 sm:$0xff]  ;;  %s4441_s26 = smov (!%p2681_p5), %s4440_s1 }
 0x610   : > { %v1373_v31 = vmul.f32 %v3067_v30, %v3059_v15  ;;  %2802 = vmatprep.subr.mxu1 %v3419_v14  ;;  %v2112_v15 = vld [vmem:[%s3948_s14 + $0x20] sm:$0xff] }
 0x612   : > { %1378 = vst.msk [vmem:[%s3963_s30 + $0x10] sm:$0xff] %vm1019_vm3, %v1373_v31  ;;  %2790 = vmatmul.mubr.msk.f32.vlgmr.msra.gmra.mrb[8].mxu0 %vm1019_vm3, %v1373_v31 }
 0x613   : > { %v3069_v32 = vpop.eup %3068  ;;  %2799 = vmatprep.mubr.msk.f32.mxu0 %vm3418_vm2, %v3419_v14  ;;  %2798 = vmatpush3.msra.mxu0 %v2667_v35 }
 0x614   : > { %v1375_v33 = vmul.f32 %v3069_v32, %v3061_v17  ;;  %2807 = vmatprep.subr.mxu0 %v3419_v14  ;;  %v2877_v17 = vpack.c.bf16 %v2113_v16, %v2112_v15 }
 0x616   : > { %1379 = vst.msk [vmem:[%s3963_s30 + $0x18] sm:$0xff] %vm1019_vm3, %v1375_v33  ;;  %2795 = vmatmul.mubr.msk.f32.vlgmr.msra.gmra.mrb[6].mxu1 %vm1019_vm3, %v1375_v33 }
 0x617   : > { %2803 = vmatpush3.msra.mxu1 %v1684_v34  ;;  %2804 = vmatprep.mubr.msk.f32.mxu1 %vm3418_vm2, %v3419_v14  ;;  %v2679_v34 = vld [vmem:[%s4438_s4] ss:$0 sm:$0xff] }
 0x618   : > { %2812 = vmatprep.subr.mxu1 %v3419_v14 }
 0x67c   : > { %v1452_v37 = vpop.f32.mrb[6].mxu0 }
 0x67d   : > { %v2781_v38 = vpop.f32.mrb[7].mxu0  ;;  %2805 = vmatmul.mubr.msk.f32.vlgmr.msra.gmra.mrb[8].mxu1 %vm1019_vm3, %v1452_v37 }
 0x67e   : > { %2813 = vmatpush3.msra.mxu1 %v2672_v36  ;;  %2814 = vmatprep.mubr.msk.f32.mxu1 %vm3418_vm2, %v3419_v14 }
 0x67f   : > { %2870 = vmatprep.subr.bf16.mxu1 %v3417_v11 }
 0x6e1   : > { %v1528_v40 = vpop.f32.mrb[4].mxu1 }
 0x6e2   : > { %v2786_v41 = vpop.f32.mrb[5].mxu1  ;;  %2800 = vmatmul.mubr.msk.f32.vlgmr.msra.gmra.mrb[10].mxu0 %vm1019_vm3, %v1528_v40 }
 0x6e3   : > { %2808 = vmatpush3.msra.mxu0 %v2670_v39  ;;  %2809 = vmatprep.mubr.msk.f32.mxu0 %vm3418_vm2, %v3419_v14 }
 0x6e4   : > { %2864 = vmatprep.subr.bf16.mxu0 %v3417_v11 }
 0x6e5   : > { %v1604_v42 = vpop.f32.mrb[8].mxu0 }
 0x6e6   : > { %v2791_v43 = vpop.f32.mrb[9].mxu0  ;;  %2810 = vmatmul.mubr.msk.f32.vlgmr.msra.gmra.mrb[12].mxu0 %vm1019_vm3, %v1604_v42 }
 0x6e7   : > { %2825 = vmatprep.mubr.msk.f32.mxu0 %vm3418_vm2, %v3419_v14 }
 0x6e9   : > { %v1680_v44 = vpop.f32.mrb[6].mxu1 }
 0x6ea   : > { %v2796_v45 = vpop.f32.mrb[7].mxu1  ;;  %2815 = vmatmul.mubr.msk.f32.vlgmr.msra.gmra.mrb[10].mxu1 %vm1019_vm3, %v1680_v44 }
 0x6eb   : > { %2844 = vmatprep.mubr.msk.f32.mxu1 %vm3418_vm2, %v3419_v14  ;;  %2872 = vmatpush3.bf16.msra.mxu1 %v2871_v10  ;;  %v2232_v45 = vld [vmem:[%s4440_s1] sm:$0xff] (!%p2681_p5) }
 0x6ec   : > { %2873 = vmatprep.subr.bf16.mxu1 %v3417_v11 }
 0x6ef   : > { %2875 = vmatpush3.bf16.msra.mxu1 %v2874_v13 }
 0x6f0   : > { %2876 = vmatprep.subr.bf16.mxu1 %v3417_v11 }
 0x6f3   : > { %2878 = vmatpush3.bf16.msra.mxu1 %v2877_v17 }
 0x6f4   : > { %2879 = vmatprep.subr.bf16.mxu1 %v3417_v11 }
 0x6f7   : > { %2881 = vmatpush3.bf16.msra.mxu1 %v2880_v28 }
 0x750   : > { %v1829_v46 = vpop.f32.mrb[8].mxu1 }
 0x751   : > { %v2806_v47 = vpop.f32.mrb[9].mxu1 }
 0x752   : > { %v2234_v47 = vld [vmem:[%s4441_s26 + $0x10] sm:$0xff] (!%p2681_p5) }
 0x7b5   : > { %v1756_v48 = vpop.f32.mrb[10].mxu0 }
 0x7b6   : > { %v1830_v49 = vadd.f32 %v1829_v46, %v1756_v48  ;;  %v2801_v50 = vpop.f32.mrb[11].mxu0  ;;  %v2233_v46 = vld [vmem:[%s4441_s26 + $0x8] sm:$0xff] (!%p2681_p5)  ;;  %v3425_v48 = vmov (!%p2681_p5), 0.0|0.0  }
 0x7b7   : > { %v2235_v50 = vld [vmem:[%s4441_s26 + $0x18] sm:$0xff] (!%p2681_p5) }
 0x7b9   : > { %v1904_v51 = vpop.f32.mrb[12].mxu0 }
 0x7ba   : > { %v1908_v52 = vadd.f32 %v1904_v51, %v1830_v49  ;;  %v2811_v53 = vpop.f32.mrb[13].mxu0  ;;  %v2883_v49 = vpack.c.bf16 (!%p2681_p5), %v2233_v46, %v2232_v45  ;;  %v3427_v51 = vmov (!%p2681_p5), 0.0  }
 0x7bd   : > { %v1980_v54 = vpop.f32.mrb[10].mxu1 }
 0x7be   : > { %v1984_v55 = vadd.f32 %v1980_v54, %v1908_v52  ;;  %v2816_v56 = vpop.f32.mrb[11].mxu1  ;;  %v2886_v52 = vpack.c.bf16 (!%p2681_p5), %v2235_v50, %v2234_v47 }
 0x7c0   : > { %v1985_v58 = vadd.f32 %v1984_v55, %v3971_v1  ;;  %v2865_v1 = vpack.c.bf16 %v2024_v3, %v2023_v2 }
 0x7c2   : > { %v1993_v14 = vadd.f32 %v2674_v57, %v1985_v58  ;;  %2866 = vmatpush3.bf16.msra.mxu0 %v2865_v1  ;;  %v2682_v57 = vld [vmem:[%s4442_s9] ss:$0 sm:$0xff] (!%p2681_p5) }
 0x7c3   : > { %2867 = vmatprep.subr.bf16.mxu0 %v3417_v11 }
 0x7c4   : > { %v1996_v59 = vsel %vm892_vm1, %v1993_v14, 0.0 }
 0x7c5   : > { %1997 = vadd.xlane.f32.xlu0 %v1996_v59 }
 0x7c6   : > { %2869 = vmatpush3.bf16.msra.mxu0 %v2868_v6 }
 0x7c7   : > { %2882 = vmatprep.subr.bf16.mxu0 (!%p2681_p5), %v3425_v48 }
 0x852   : > { %v1998_v60 = vpop.xlane.xlu0 %1997 }
 0x853   : > { %v1999_v61 = vmul.f32 0.03125, %v1998_v60 }
 0x855   : > { %v2000_v62 = vsub.f32 %v1993_v14, %v1999_v61  ;;  %v2684_v61 = vld [vmem:[%s4444_s3] ss:$0 sm:$0xff] (!%p2681_p5) }
 0x857   : > { %v2001_v63 = vmul.f32 %v2000_v62, %v2000_v62 }
 0x859   : > { %v2002_v0 = vsel %vm892_vm1, %v2001_v63, 0.0 }
 0x85a   : > { %2003 = vadd.xlane.f32.xlu1 %v2002_v0 }
 0x8e7   : > { %v2004_v18 = vpop.xlane.xlu1 %2003 }
 0x8e8   : > { %v2005_v19 = vmul.f32 0.03125, %v2004_v18 }
 0x8ea   : > { %v2006_v20 = vadd.f32 1e-05, %v2005_v19 }
 0x8ec   : > { %3070 = vrsqrt.f32 %v2006_v20 }
 0x8f6   : > { %v3071_v21 = vpop.eup %3070 }
 0x8f7   : > { %v2008_v23 = vmul.f32 %v3071_v21, %v2000_v62 }
 0x8f9   : > { %v2015_v25 = vmul.f32 %v2675_v22, %v2008_v23 }
 0x8fb   : > { %v2022_v11 = vadd.f32 %v2676_v24, %v2015_v25 }
 0x8fd   : > { %2826 = vmatmul.mubr.msk.f32.vlgmr.msra.gmra.mrb[14].mxu0 %vm892_vm1, %v2022_v11 }
 0x8fe   : > { %2855 = vmatprep.mubr.msk.f32.mxu0 (!%p2681_p5), %vm3426_vm6, %v3427_v51  ;;  %2884 = vmatpush3.bf16.msra.mxu0 (!%p2681_p5), %v2883_v49 }
 0x8ff   : > { %2885 = vmatprep.subr.bf16.mxu0 (!%p2681_p5), %v3425_v48 }
 0x902   : > { %2887 = vmatpush3.bf16.msra.mxu0 (!%p2681_p5), %v2886_v52 }
 0x9d0   : > { %v2103_v30 = vpop.f32.mrb[14].mxu0 }
 0x9d1   : > { %v2104_v31 = vadd.f32 %v2677_v29, %v2103_v30  ;;  %v2827_v32 = vpop.f32.mrb[15].mxu0 }
 0x9d3   : > { %v2107_v33 = vmax.f32 %v2104_v31, 0.0 }
 0x9d5   : > { %2845 = vmatmul.mubr.msk.f32.vlgmr.msra.gmra.mrb[12].mxu1 %vm2123_vm5, %v2107_v33 }
 0xaa7   : > { %2202 = sbr.rel (%p2681_p5) target bundleno = 3261 (0xcbd), region = 116 }
 0xaa8   : > { %v2193_v35 = vpop.f32.mrb[12].mxu1 }
 0xaa9   : > { %v2194_v36 = vadd.f32 %v2679_v34, %v2193_v35  ;;  %v2846_v37 = vpop.f32.mrb[13].mxu1 }
 0xaab   : > { %v2197_v38 = vadd.f32 %v2194_v36, %v1993_v14  ;;  %v2683_v14 = vld [vmem:[%s4443_s17] ss:$0 sm:$0xff] (!%p2681_p5) }
 0xaad   : > { %2198 = vst.msk [vmem:[#allocation2] sm:$0xff] %vm892_vm1, %v2197_v38  ;;  %v2205_v39 = vsel (!%p2681_p5), %vm892_vm1, %v2197_v38, 0.0 }
 0xaae   : > { %2206 = vadd.xlane.f32.xlu0 %v2205_v39 }
 0xb3b   : > { %v2207_v40 = vpop.xlane.xlu0 %2206 }
 0xb3c   : > { %v2208_v41 = vmul.f32 0.03125, %v2207_v40 }
 0xb3e   : > { %v2209_v42 = vsub.f32 %v2197_v38, %v2208_v41 }
 0xb40   : > { %v2210_v43 = vmul.f32 %v2209_v42, %v2209_v42 }
 0xb42   : > { %v2211_v44 = vsel %vm892_vm1, %v2210_v43, 0.0 }
 0xb43   : > { %2212 = vadd.xlane.f32.xlu0 %v2211_v44 }
 0xbd0   : > { %v2213_v53 = vpop.xlane.xlu0 %2212 }
 0xbd1   : > { %v2214_v54 = vmul.f32 0.03125, %v2213_v53 }
 0xbd3   : > { %v2215_v55 = vadd.f32 1e-05, %v2214_v54 }
 0xbd5   : > { %3072 = vrsqrt.f32 %v2215_v55 }
 0xbdf   : > { %v3073_v56 = vpop.eup %3072 }
 0xbe0   : > { %v2217_v58 = vmul.f32 %v3073_v56, %v2209_v42 }
 0xbe2   : > { %v2224_v59 = vmul.f32 %v2682_v57, %v2217_v58 }
 0xbe4   : > { %v2231_v60 = vadd.f32 %v2683_v14, %v2224_v59 }
 0xbe6   : > { %2856 = vmatmul.mubr.msk.f32.vlgmr.msra.gmra.mrb[0].mxu0 %vm892_vm1, %v2231_v60 }
 0xcb9   : > { %v2312_v62 = vpop.f32.mrb[0].mxu0 }
 0xcba   : > { %v2313_v63 = vadd.f32 %v2684_v61, %v2312_v62  ;;  %v2857_v0 = vpop.f32.mrb[1].mxu0 }
 0xcbc   : > { %2316 = vst [vmem:[%s3967_s8] sm:$0xff] %v2313_v63 }
 0xcbd PF: > { %s4445_s15 = sld [smem:[#allocation27_spill]]  ;;  %s4446_s10 = sld [smem:[#allocation28_spill]] }
 0xcbe   : > { %s4447_s19 = sld [smem:[#allocation38_spill]]  ;;  %s2338_s18 = sshll.u32 %s3963_s30, 4  ;;  %s4173_s18 = int_to_ptr.vmem [resolvable:$true] %s2338_s18 }
 0xcbf   : > { %s4448_s1 = sld [smem:[#allocation59_spill]]  ;;  %s4450_s0 = sand.u32 1, %s3362_s28  }
 0xcc0   : > { %s4182_s20 = scalar_lea.sflag [#allocation5], %s4450_s0  ;;  %s3224_s25 = scalar_lea.vmem %s4173_s18, 512 }
 0xcc1   : > { %p3225_p1 = scmp.ne.s32.totalorder %s4173_s18, %s3224_s25  ;;  %s3428_s30 = smov [#allocation12]  }
 0xcc2   : > { %s3228_s2 = sshll.u32 %s3428_s30, 4  ;;  %s3229_s2 = int_to_ptr.vmem [resolvable:$false] %s3228_s2 }
 0xcc3   : > { %s2688_s22 = sshll.u32 %s4445_s15, 2  ;;  %s2689_s24 = sshll.u32 %s4446_s10, 3 }
 0xcc4   : > { %s2335_s4 = sadd.s32 %s2689_s24, %s2688_s22  ;;  %p4451_p10 = scmp.ne.s32.totalorder %s4447_s19, 0 }
 0xcc5   : > { %s2690_s5 = sshll.u32 %s2335_s4, 7  ;;  %s4449_s6 = smov %s4448_s1 }
 0xcc6   : > { %s4178_s27 = scalar_lea.hbm %s4448_s1, %s2690_s5  ;;  %p3226_p3 = pnand %p3225_p1, %p4451_p10 }
 0xcc7   : > { %s3230_s12 = scalar_lea.vmem %s3229_s2, 1024  ;;  %p3231_p8 = scmp.lt.s32.totalorder %s4173_s18, %s3229_s2 }
 0xcc8   : > { %p3227_p0 = pneg %p3226_p3  ;;  %p3232_p12 = scmp.lt.s32.totalorder %s3230_s12, %s3224_s25 }
 0xcca   : > { %p3233_p2 = por %p3232_p12, %p3231_p8 }
 0xccc   : > { %p3234_p9 = pnand %p3233_p2, %p3227_p0 }
 0xcce   : > { %3237 = shalt.err (!%p3234_p9)
}
 0xccf   : > { %s3238_s16 = scalar_lea.hbm %s4178_s27, 512  ;;  %s3242_s21 = scalar_lea.hbm %s4449_s6, 2048 }
 0xcd0   : > { %p3239_p4 = scmp.ne.s32.totalorder %s4178_s27, %s3238_s16  ;;  %p3243_p7 = scmp.lt.u32.totalorder %s4178_s27, %s4449_s6 }
 0xcd1   : > { %p3244_p6 = scmp.lt.u32.totalorder %s3242_s21, %s3238_s16  ;;  %p3246_p1 = scmp.lt.u32.totalorder %s3238_s16, %s4178_s27 }
 0xcd2   : > { %p3240_p11 = pnand %p3239_p4, %p4451_p10 }
 0xcd3   : > { %p3245_p5 = por %p3244_p6, %p3243_p7 }
 0xcd4   : > { %p3241_p13 = pneg %p3240_p11 }
 0xcd5   : > { %p3247_p3 = por %p3246_p1, %p3245_p5 }
 0xcd7   : > { %p3248_p0 = pnand %p3247_p3, %p3241_p13 }
 0xcd9   : > { %3251 = shalt.err (!%p3248_p0)
}
 0xcda   : > { %s3429_s29 = smov 128   ;;  %s4452_s3 = sld [smem:[#allocation39_spill]] }
 0xcdb   : > { %s3430_s15 = smov 8   ;;  %s2691_s22 = sshll.u32 %s4446_s10, 7 }
 0xcdc   : > { %2898 = dma.vmem_to_hbm [thread:$0]  (%p4451_p10), %s4173_s18, 512, %s4178_s27, %s4182_s20, %s3429_s29, %s3429_s29, %s3430_s15  }
 0xcdd   : > { %s4453_s5 = sld [smem:[#allocation60_spill]]  ;;  %s2354_s14 = sshll.u32 %s3967_s8, 4  ;;  %s2355_s14 = int_to_ptr.vmem [resolvable:$true] %s2354_s14 }
 0xcde   : > { %s2323_s1 = scalar_lea.sflag [#allocation14], %s3890_s23  ;;  %s3252_s0 = scalar_lea.vmem %s2355_s14, 128 }
 0xcdf   : > { %p3253_p8 = scmp.ne.s32.totalorder %s2355_s14, %s3252_s0  ;;  %s3431_s25 = smov [#allocation13]  }
 0xce0   : > { %p4454_p12 = scmp.ne.s32.totalorder %s4452_s3, 0  ;;  %s3256_s30 = sshll.u32 %s3431_s25, 4  ;;  %s3257_s30 = int_to_ptr.vmem [resolvable:$false] %s3256_s30 }
 0xce1   : > { %s3258_s2 = scalar_lea.vmem %s3257_s30, 256  ;;  %p3259_p4 = scmp.lt.s32.totalorder %s2355_s14, %s3257_s30 }
 0xce2   : > { %p3254_p2 = pnand %p3253_p8, %p4454_p12  ;;  %p3260_p10 = scmp.lt.s32.totalorder %s3258_s2, %s3252_s0 }
 0xce3   : > { %s4210_s7 = scalar_lea.hbm %s4453_s5, %s2691_s22 }
 0xce4   : > { %p3255_p9 = pneg %p3254_p2  ;;  %p3261_p11 = por %p3260_p10, %p3259_p4 }
 0xce6   : > { %p3262_p13 = pnand %p3261_p11, %p3255_p9 }
 0xce8   : > { %3265 = shalt.err (!%p3262_p13)
}
 0xce9   : > { %s3266_s8 = scalar_lea.hbm %s4210_s7, 128  ;;  %s3270_s19 = scalar_lea.hbm %s4453_s5, 256 }
 0xcea   : > { %p3267_p7 = scmp.ne.s32.totalorder %s4210_s7, %s3266_s8  ;;  %p3271_p1 = scmp.lt.u32.totalorder %s4210_s7, %s4453_s5 }
 0xceb   : > { %p3272_p3 = scmp.lt.u32.totalorder %s3270_s19, %s3266_s8  ;;  %p3274_p8 = scmp.lt.u32.totalorder %s3266_s8, %s4210_s7 }
 0xcec   : > { %p3268_p6 = pnand %p3267_p7, %p4454_p12 }
 0xced   : > { %p3273_p0 = por %p3272_p3, %p3271_p1 }
 0xcee   : > { %p3269_p5 = pneg %p3268_p6 }
 0xcef   : > { %p3275_p2 = por %p3274_p8, %p3273_p0 }
 0xcf1   : > { %p3276_p9 = pnand %p3275_p2, %p3269_p5 }
 0xcf3   : > { %3279 = shalt.err (!%p3276_p9)
}
 0xcf4   : > { %2899 = dma.vmem_to_hbm [thread:$0]  (%p4454_p12), %s2355_s14, 128, %s4210_s7, %s2323_s1  }
 0xcf5 PF: > { %s4455_s20 = sld [smem:[#allocation31_spill]]  ;;  %s4456_s12 = sld [smem:[#allocation20_spill]] }
 0xcf6   : > { %s4457_s16 = sld [smem:[#allocation40_spill]] }
 0xcfb   : > { %p2926_p4 = scmp.ge.s32.totalorder %s4455_s20, 2  ;;  %s2366_s9 = sand.u32 1, %s4456_s12  }
 0xcfc   : > { %p4458_p10 = scmp.ne.s32.totalorder %s4457_s16, 0  ;;  %s2367_s11 = scalar_lea.sflag [#allocation5], %s2366_s9 }
 0xcfe   : > { %p2919_p11 = pnand %p2926_p4, %p4458_p10 }
 0xd00   : > { %3349 = dma.done.wait (!%p2919_p11), %s2367_s11, 512  }
 0xd01   : > { %3351 = vsyncadd (!%p2919_p11), %s2367_s11, 4294966784  ;;  %s4459_s21 = sld [smem:[#allocation24_spill]] }
 0xd02   : > { %s4460_s17 = sld [smem:[#allocation41_spill]] }
 0xd07   : > { %s2375_s13 = sand.u32 1, %s4459_s21  }
 0xd08   : > { %p4461_p13 = scmp.ne.s32.totalorder %s4460_s17, 0  ;;  %s2376_s29 = scalar_lea.sflag [#allocation14], %s2375_s13 }
 0xd0a   : > { %p2922_p7 = pnand %p2926_p4, %p4461_p13 }
 0xd0c   : > { %3353 = dma.done.wait (!%p2922_p7), %s2376_s29, 128  }
 0xd0d   : > { %3355 = vsyncadd (!%p2922_p7), %s2376_s29, 4294967168  ;;  %s44_s25 = sadd.s32 1, %s4455_s20   ;;  %s4463_s15 = sld [smem:[#allocation21_spill]] }
 0xd0e   : > { %p4239_p12 = scmp.ge.s32.totalorder %s44_s25, 6   ;;  %s4464_s29 = sld [smem:[#allocation37_spill]] }
 0xd0f   : > { %s4465_s30 = sld [smem:[#allocation22_spill]]  ;;  %s4466_s0 = sld [smem:[#allocation23_spill]] }
 0xd10   : > { %s4467_s19 = sld [smem:[#allocation33_spill]]  ;;  %s4468_s1 = sld [smem:[#allocation25_spill]] }
 0xd11   : > { %s4469_s20 = sld [smem:[#allocation26_spill]]  ;;  %s4470_s21 = sld [smem:[#allocation36_spill]] }
 0xd12   : > { %s4471_s22 = sld [smem:[#allocation29_spill]]  ;;  %s4472_s2 = sld [smem:[#allocation30_spill]] }
 0xd13   : > { %s4473_s23 = sld [smem:[#allocation32_spill]]  ;;  %s4474_s24 = sld [smem:[#allocation35_spill]] }
 0xd14   : > { %s4475_s27 = smov %s3362_s28  ;;  %s4476_s28 = smov %s4463_s15 }
 0xd15   :  { %43 = sbr.rel (!%p4239_p12) target bundleno = 36 (0x24), region = 233 }
 0xd1c   :  { %2381 = vsyncpa [#allocation4], 1 }
 0xd1d   :  { %2383 = vsyncpa [#allocation4 + $0x1], 1 }
 0xd1e   :  { %2384 = vsyncpa [#allocation7], 1 }
 0xd1f   :  { %2386 = vsyncpa [#allocation7 + $0x1], 1 }
 0xd20   :  { %2387 = vsyncpa [#allocation10], 1 }
 0xd21   :  { %2389 = vsyncpa [#allocation10 + $0x1], 1 }
 0xd22   :  { %2390 = vsyncpa [#allocation5], 1 }
 0xd23   :  { %2392 = vsyncpa [#allocation5 + $0x1], 1 }
 0xd24   :  { %2393 = vsyncpa [#allocation14], 1 }
 0xd25   :  { %2395 = vsyncpa [#allocation14 + $0x1], 1 }

</bundles_post_ra>
